<compile_context>
chip_gen: v7x
topology: tpu7x:2x2x1
jax: 0.10.0
libtpu: 0.0.40
codegen_flags: <defaults>
</compile_context>

<pallas_src>
import jax
import jax.numpy as jnp
from jax.experimental import pallas as pl
from jax.experimental.pallas import tpu as pltpu

NEG_SLOPE = 0.1  # LeakyReLU slope for get_activation('leaky')


def _leaky(x):
    return jnp.where(x > 0, x, NEG_SLOPE * x)


# --------------------------- fused Pallas kernel ----------------------------

def net_fused_kernel(att_ref, basis_ref, feat_ref, adj_ref,
                     fc0_w_ref, fc0_b_ref, w1_ref, fc1_w_ref, fc1_b_ref,
                     p_ref, wc_ref, sel_u_ref, sel_i_ref,
                     pred_ref, reg_ref, user_out_ref, movie_out_ref, w_out_ref):
    f32 = jnp.float32
    bf16 = jnp.bfloat16

    R, B = att_ref.shape                 # ratings, basis units (att lives in SMEM)
    N_U = user_out_ref.shape[0]
    N_I = movie_out_ref.shape[0]
    Kb = p_ref.shape[0]                  # decoder basis functions
    E, C = pred_ref.shape

    # ---- W_r = sum_b att[r, b] * basis[b]  (layer-0 basis decomposition) ----
    basis_b = [basis_ref[b] for b in range(B)]          # each (D, AGG) f32
    w_list = []
    for r in range(R):
        w_r = att_ref[r, 0] * basis_b[0]
        for b in range(1, B):
            w_r = w_r + att_ref[r, b] * basis_b[b]
        w_out_ref[r] = w_r                               # returned W stays f32
        w_list.append(w_r)

    feat0 = feat_ref[...]                                # (N, D) bf16, rows=[users; items]
    adj = adj_ref[...]                                   # (N, R*N) bf16 block adjacency

    # ---- encoder layer 0 (GCMCLayer, shared params, agg_accum='sum') --------
    h0 = jnp.concatenate(
        [jnp.dot(feat0, w_list[r].astype(bf16), preferred_element_type=f32)
         for r in range(R)], axis=0).astype(bf16)        # (R*N, AGG)
    agg0 = _leaky(jnp.dot(adj, h0, preferred_element_type=f32)).astype(bf16)   # (N, AGG)
    out0 = jnp.dot(agg0, fc0_w_ref[...], preferred_element_type=f32) + fc0_b_ref[...]

    # ---- encoder layer 1 -----------------------------------------------------
    feat1 = out0.astype(bf16)
    h1 = jnp.concatenate(
        [jnp.dot(feat1, w1_ref[r], preferred_element_type=f32)
         for r in range(R)], axis=0).astype(bf16)        # (R*N, O)
    agg1 = _leaky(jnp.dot(adj, h1, preferred_element_type=f32)).astype(bf16)   # (N, O)
    out1 = jnp.dot(agg1, fc1_w_ref[...], preferred_element_type=f32) + fc1_b_ref[...]

    out_sum = out0 + 0.5 * out1                          # user_out += user_o / (i+1)
    user_out = out_sum[:N_U]
    movie_out = out_sum[N_U:]
    user_out_ref[...] = user_out
    movie_out_ref[...] = movie_out

    # ---- BiDecoder (edge gather fused in-kernel as one-hot matmuls) ---------
    u_e = jnp.dot(sel_u_ref[...], user_out.astype(bf16),
                  preferred_element_type=f32)            # (E, O)
    i_e = jnp.dot(sel_i_ref[...], movie_out.astype(bf16),
                  preferred_element_type=f32)            # (E, O)
    u_e_b = u_e.astype(bf16)
    pred = jnp.zeros((E, C), f32)
    for k in range(Kb):
        up_k = jnp.dot(u_e_b, p_ref[k], preferred_element_type=f32)   # (E, O)
        s_k = jnp.sum(up_k * i_e, axis=-1, keepdims=True)             # (E, 1)
        pred = pred + s_k * wc_ref[k]                                 # (E,1)*(1,C)
    pred_ref[...] = pred                                 # logits stored once

    # ---- reg_loss = sum_i -sum(cosine_similarity(W[i], W[i-1], dim=1)) ------
    eps = 1e-8
    reg = jnp.zeros((1, 1), f32)
    for r in range(1, R):
        a = w_list[r]
        b_ = w_list[r - 1]
        num = jnp.sum(a * b_, axis=1, keepdims=True)
        na = jnp.sqrt(jnp.sum(a * a, axis=1, keepdims=True))
        nb = jnp.sqrt(jnp.sum(b_ * b_, axis=1, keepdims=True))
        cos = num / (jnp.maximum(na, eps) * jnp.maximum(nb, eps))
        reg = reg - jnp.sum(cos)
    reg_ref[...] = reg


# --------------------------- model (glue in JAX) ----------------------------

def init_params(key, R, D, AGG, O, B, K, C):
    ks = jax.random.split(key, 7)
    s = 0.1
    return dict(
        att=jax.random.normal(ks[0], (R, B), jnp.float32) * s,        # layer-0 basis mixing
        basis=jax.random.normal(ks[1], (B, D, AGG), jnp.float32) * s,  # layer-0 basis weights
        fc0_w=jax.random.normal(ks[2], (AGG, O), jnp.float32) * s,     # shared ufc/ifc (layer 0)
        fc0_b=jnp.zeros((1, O), jnp.float32),
        W1=jax.random.normal(ks[3], (R, O, O), jnp.float32) * s,       # layer-1 per-rating W_r
        fc1_w=jax.random.normal(ks[4], (O, O), jnp.float32) * s,       # shared ufc/ifc (layer 1)
        fc1_b=jnp.zeros((1, O), jnp.float32),
        P=jax.random.normal(ks[5], (K, O, O), jnp.float32) * s,        # BiDecoder basis matrices
        Wc=jax.random.normal(ks[6], (K, C), jnp.float32) * s,          # BiDecoder combine (no bias)
    )


def net_forward(params, adj_iu, adj_ui, dec_u, dec_i, ufeat, ifeat):
    R, N_I, N_U = adj_iu.shape
    B, D, AGG = params["basis"].shape
    O = params["fc0_w"].shape[1]
    Kb = params["P"].shape[0]
    C = params["Wc"].shape[1]
    E = dec_u.shape[0]
    f32, bf16 = jnp.float32, jnp.bfloat16

    # Block adjacency: destination rows = [users; items], source-column block r
    # holds rating-r edges (user->item and item->user sub-blocks, zero diagonal
    # blocks).  Built in the wrapper — it is input data, not compute.
    zu = jnp.zeros((N_U, N_U), f32)
    zi = jnp.zeros((N_I, N_I), f32)
    blocks = []
    for r in range(R):
        top = jnp.concatenate([zu, adj_ui[r]], axis=1)   # users <- [users|items]
        bot = jnp.concatenate([adj_iu[r], zi], axis=1)   # items <- [users|items]
        blocks.append(jnp.concatenate([top, bot], axis=0))
    adj_all = jnp.concatenate(blocks, axis=1).astype(bf16)            # (N, R*N)

    feat_all = jnp.concatenate([ufeat, ifeat], axis=0).astype(bf16)   # (N, D)
    sel_u = jax.nn.one_hot(dec_u, N_U, dtype=bf16)                    # (E, N_U)
    sel_i = jax.nn.one_hot(dec_i, N_I, dtype=bf16)                    # (E, N_I)

    vmem = lambda: pl.BlockSpec(memory_space=pltpu.MemorySpace.VMEM)
    smem = lambda: pl.BlockSpec(memory_space=pltpu.MemorySpace.SMEM)

    out_shape = (
        jax.ShapeDtypeStruct((E, C), f32),        # pred_ratings
        jax.ShapeDtypeStruct((1, 1), f32),        # reg_loss
        jax.ShapeDtypeStruct((N_U, O), f32),      # user_out
        jax.ShapeDtypeStruct((N_I, O), f32),      # movie_out
        jax.ShapeDtypeStruct((R, D, AGG), f32),   # W
    )

    # TODO(synk): for realistic graph sizes (esp. v7x 64 MiB VMEM) the dense
    # block adjacency must be tiled over destination nodes (parallel grid axis
    # for megacore) and source nodes (arbitrary/innermost); at these demo sizes
    # everything fits in VMEM so a single grid-less invocation is optimal.
    pred, reg, user_out, movie_out, W = pl.pallas_call(
        net_fused_kernel,
        out_shape=out_shape,
        in_specs=[smem(),            # att (scalars, read per (r, b))
                  vmem(),            # basis
                  vmem(),            # feat_all
                  vmem(),            # adj_all
                  vmem(), vmem(),    # fc0_w, fc0_b
                  vmem(),            # W1
                  vmem(), vmem(),    # fc1_w, fc1_b
                  vmem(), vmem(),    # P, Wc
                  vmem(), vmem()],   # sel_u, sel_i
        out_specs=(vmem(), vmem(), vmem(), vmem(), vmem()),
    )(params["att"], params["basis"], feat_all, adj_all,
      params["fc0_w"].astype(bf16), params["fc0_b"],
      params["W1"].astype(bf16),
      params["fc1_w"].astype(bf16), params["fc1_b"],
      params["P"].astype(bf16), params["Wc"].reshape(Kb, 1, C),
      sel_u, sel_i)

    return pred, reg[0, 0], user_out, movie_out, W


# TODO(synk): DGL sparse message passing and train-mode dropout have no clean
# Pallas equivalent here; graph ops use dense per-rating normalized adjacencies
# and the layer runs in eval mode (dropout omitted).

if __name__ == "__main__":
    key = jax.random.PRNGKey(0)
    N_U, N_I = 16, 24   # users, items
    R = 3               # rating_vals = [1, 2, 3]
    D = 32              # src_in_units == dst_in_units
    AGG = 64            # gcn_agg_units (agg_accum = 'sum')
    O = 32              # gcn_out_units
    B = 4               # basis_units of layer-0 W_r decomposition
    K = 2               # gen_r_num_basis_func
    C = R               # BiDecoder num_classes
    E = 40              # edges in dec_graph

    k_graph, k_fu, k_fi, k_du, k_di, k_param = jax.random.split(key, 6)

    # enc_graph: each (item, user) pair gets a rating in {0..R}; 0 = no edge.
    ratings = jax.random.randint(k_graph, (N_I, N_U), 0, R + 1)
    adj = jnp.stack([(ratings == (r + 1)).astype(jnp.float32) for r in range(R)])
    mask = (ratings > 0).astype(jnp.float32)
    deg_i = jnp.maximum(mask.sum(axis=1), 1.0)
    deg_u = jnp.maximum(mask.sum(axis=0), 1.0)
    norm = (1.0 / jnp.sqrt(deg_i))[:, None] * (1.0 / jnp.sqrt(deg_u))[None, :]
    adj_iu = adj * norm[None]                         # (R, N_i, N_u) user -> item
    adj_ui = jnp.transpose(adj_iu, (0, 2, 1))         # (R, N_u, N_i) item -> user

    ufeat = jax.random.normal(k_fu, (N_U, D), jnp.float32)
    ifeat = jax.random.normal(k_fi, (N_I, D), jnp.float32)

    dec_u = jax.random.randint(k_du, (E,), 0, N_U)
    dec_i = jax.random.randint(k_di, (E,), 0, N_I)

    params = init_params(k_param, R, D, AGG, O, B, K, C)

    fwd = jax.jit(net_forward)
    pred_ratings, reg_loss, user_out, movie_out, W = fwd(
        params, adj_iu, adj_ui, dec_u, dec_i, ufeat, ifeat)
    jax.block_until_ready((pred_ratings, reg_loss, user_out, movie_out, W))

    assert pred_ratings.shape == (E, C)
    assert user_out.shape == (N_U, O)
    assert movie_out.shape == (N_I, O)
    assert W.shape == (R, D, AGG)
    assert jnp.isfinite(reg_loss)
    assert bool(jnp.all(jnp.isfinite(pred_ratings)))
    print("KERNEL_OK")
</pallas_src>

<mosaic_0001>
module attributes {stable_mosaic.version = 11 : i64} {
  func.func @net_fused_kernel(%arg0: memref<3x4xf32, #tpu.memory_space<smem>>, %arg1: memref<4x32x64xf32, #tpu.memory_space<vmem>>, %arg2: memref<40x32xbf16, #tpu.memory_space<vmem>>, %arg3: memref<40x120xbf16, #tpu.memory_space<vmem>>, %arg4: memref<64x32xbf16, #tpu.memory_space<vmem>>, %arg5: memref<1x32xf32, #tpu.memory_space<vmem>>, %arg6: memref<3x32x32xbf16, #tpu.memory_space<vmem>>, %arg7: memref<32x32xbf16, #tpu.memory_space<vmem>>, %arg8: memref<1x32xf32, #tpu.memory_space<vmem>>, %arg9: memref<2x32x32xbf16, #tpu.memory_space<vmem>>, %arg10: memref<2x1x3xf32, #tpu.memory_space<vmem>>, %arg11: memref<40x16xbf16, #tpu.memory_space<vmem>>, %arg12: memref<40x24xbf16, #tpu.memory_space<vmem>>, %arg13: memref<40x3xf32, #tpu.memory_space<vmem>>, %arg14: memref<1x1xf32, #tpu.memory_space<vmem>>, %arg15: memref<16x32xf32, #tpu.memory_space<vmem>>, %arg16: memref<24x32xf32, #tpu.memory_space<vmem>>, %arg17: memref<3x32x64xf32, #tpu.memory_space<vmem>>) attributes {dimension_semantics = [], scalar_prefetch = 0 : i64, scratch_operands = 0 : i64, tpu.core_type = #tpu.core_type<tc>} {
    %c0 = arith.constant 0 : index
    %c0_0 = arith.constant 0 : index
    %c0_1 = arith.constant 0 : index
    %0 = vector.load %arg1[%c0, %c0_0, %c0_1] : memref<4x32x64xf32, #tpu.memory_space<vmem>>, vector<1x32x64xf32>
    %1 = vector.shape_cast %0 : vector<1x32x64xf32> to vector<32x64xf32>
    %c1 = arith.constant 1 : index
    %c0_2 = arith.constant 0 : index
    %c0_3 = arith.constant 0 : index
    %2 = vector.load %arg1[%c1, %c0_2, %c0_3] : memref<4x32x64xf32, #tpu.memory_space<vmem>>, vector<1x32x64xf32>
    %3 = vector.shape_cast %2 : vector<1x32x64xf32> to vector<32x64xf32>
    %c2 = arith.constant 2 : index
    %c0_4 = arith.constant 0 : index
    %c0_5 = arith.constant 0 : index
    %4 = vector.load %arg1[%c2, %c0_4, %c0_5] : memref<4x32x64xf32, #tpu.memory_space<vmem>>, vector<1x32x64xf32>
    %5 = vector.shape_cast %4 : vector<1x32x64xf32> to vector<32x64xf32>
    %c3 = arith.constant 3 : index
    %c0_6 = arith.constant 0 : index
    %c0_7 = arith.constant 0 : index
    %6 = vector.load %arg1[%c3, %c0_6, %c0_7] : memref<4x32x64xf32, #tpu.memory_space<vmem>>, vector<1x32x64xf32>
    %7 = vector.shape_cast %6 : vector<1x32x64xf32> to vector<32x64xf32>
    %c0_8 = arith.constant 0 : index
    %c0_9 = arith.constant 0 : index
    %8 = memref.load %arg0[%c0_8, %c0_9] : memref<3x4xf32, #tpu.memory_space<smem>>
    %9 = vector.broadcast %8 : f32 to vector<32x64xf32>
    %10 = arith.mulf %9, %1 : vector<32x64xf32>
    %c0_10 = arith.constant 0 : index
    %c1_11 = arith.constant 1 : index
    %11 = memref.load %arg0[%c0_10, %c1_11] : memref<3x4xf32, #tpu.memory_space<smem>>
    %12 = vector.broadcast %11 : f32 to vector<32x64xf32>
    %13 = arith.mulf %12, %3 : vector<32x64xf32>
    %14 = arith.addf %10, %13 : vector<32x64xf32>
    %c0_12 = arith.constant 0 : index
    %c2_13 = arith.constant 2 : index
    %15 = memref.load %arg0[%c0_12, %c2_13] : memref<3x4xf32, #tpu.memory_space<smem>>
    %16 = vector.broadcast %15 : f32 to vector<32x64xf32>
    %17 = arith.mulf %16, %5 : vector<32x64xf32>
    %18 = arith.addf %14, %17 : vector<32x64xf32>
    %c0_14 = arith.constant 0 : index
    %c3_15 = arith.constant 3 : index
    %19 = memref.load %arg0[%c0_14, %c3_15] : memref<3x4xf32, #tpu.memory_space<smem>>
    %20 = vector.broadcast %19 : f32 to vector<32x64xf32>
    %21 = arith.mulf %20, %7 : vector<32x64xf32>
    %22 = arith.addf %18, %21 : vector<32x64xf32>
    %c0_16 = arith.constant 0 : index
    %c0_17 = arith.constant 0 : index
    %c0_18 = arith.constant 0 : index
    %23 = vector.load %arg17[%c0_16, %c0_17, %c0_18] : memref<3x32x64xf32, #tpu.memory_space<vmem>>, vector<1x32x64xf32>
    %24 = vector.shape_cast %23 : vector<1x32x64xf32> to vector<32x64xf32>
    %25 = vector.shape_cast %22 : vector<32x64xf32> to vector<1x32x64xf32>
    tpu.vector_store %arg17[%c0_16, %c0_17, %c0_18], %25 {strides = array<i32>} : memref<3x32x64xf32, #tpu.memory_space<vmem>>, vector<1x32x64xf32>,
    %c1_19 = arith.constant 1 : index
    %c0_20 = arith.constant 0 : index
    %26 = memref.load %arg0[%c1_19, %c0_20] : memref<3x4xf32, #tpu.memory_space<smem>>
    %27 = vector.broadcast %26 : f32 to vector<32x64xf32>
    %28 = arith.mulf %27, %1 : vector<32x64xf32>
    %c1_21 = arith.constant 1 : index
    %c1_22 = arith.constant 1 : index
    %29 = memref.load %arg0[%c1_21, %c1_22] : memref<3x4xf32, #tpu.memory_space<smem>>
    %30 = vector.broadcast %29 : f32 to vector<32x64xf32>
    %31 = arith.mulf %30, %3 : vector<32x64xf32>
    %32 = arith.addf %28, %31 : vector<32x64xf32>
    %c1_23 = arith.constant 1 : index
    %c2_24 = arith.constant 2 : index
    %33 = memref.load %arg0[%c1_23, %c2_24] : memref<3x4xf32, #tpu.memory_space<smem>>
    %34 = vector.broadcast %33 : f32 to vector<32x64xf32>
    %35 = arith.mulf %34, %5 : vector<32x64xf32>
    %36 = arith.addf %32, %35 : vector<32x64xf32>
    %c1_25 = arith.constant 1 : index
    %c3_26 = arith.constant 3 : index
    %37 = memref.load %arg0[%c1_25, %c3_26] : memref<3x4xf32, #tpu.memory_space<smem>>
    %38 = vector.broadcast %37 : f32 to vector<32x64xf32>
    %39 = arith.mulf %38, %7 : vector<32x64xf32>
    %40 = arith.addf %36, %39 : vector<32x64xf32>
    %c1_27 = arith.constant 1 : index
    %c0_28 = arith.constant 0 : index
    %c0_29 = arith.constant 0 : index
    %41 = vector.load %arg17[%c1_27, %c0_28, %c0_29] : memref<3x32x64xf32, #tpu.memory_space<vmem>>, vector<1x32x64xf32>
    %42 = vector.shape_cast %41 : vector<1x32x64xf32> to vector<32x64xf32>
    %43 = vector.shape_cast %40 : vector<32x64xf32> to vector<1x32x64xf32>
    tpu.vector_store %arg17[%c1_27, %c0_28, %c0_29], %43 {strides = array<i32>} : memref<3x32x64xf32, #tpu.memory_space<vmem>>, vector<1x32x64xf32>,
    %c2_30 = arith.constant 2 : index
    %c0_31 = arith.constant 0 : index
    %44 = memref.load %arg0[%c2_30, %c0_31] : memref<3x4xf32, #tpu.memory_space<smem>>
    %45 = vector.broadcast %44 : f32 to vector<32x64xf32>
    %46 = arith.mulf %45, %1 : vector<32x64xf32>
    %c2_32 = arith.constant 2 : index
    %c1_33 = arith.constant 1 : index
    %47 = memref.load %arg0[%c2_32, %c1_33] : memref<3x4xf32, #tpu.memory_space<smem>>
    %48 = vector.broadcast %47 : f32 to vector<32x64xf32>
    %49 = arith.mulf %48, %3 : vector<32x64xf32>
    %50 = arith.addf %46, %49 : vector<32x64xf32>
    %c2_34 = arith.constant 2 : index
    %c2_35 = arith.constant 2 : index
    %51 = memref.load %arg0[%c2_34, %c2_35] : memref<3x4xf32, #tpu.memory_space<smem>>
    %52 = vector.broadcast %51 : f32 to vector<32x64xf32>
    %53 = arith.mulf %52, %5 : vector<32x64xf32>
    %54 = arith.addf %50, %53 : vector<32x64xf32>
    %c2_36 = arith.constant 2 : index
    %c3_37 = arith.constant 3 : index
    %55 = memref.load %arg0[%c2_36, %c3_37] : memref<3x4xf32, #tpu.memory_space<smem>>
    %56 = vector.broadcast %55 : f32 to vector<32x64xf32>
    %57 = arith.mulf %56, %7 : vector<32x64xf32>
    %58 = arith.addf %54, %57 : vector<32x64xf32>
    %c2_38 = arith.constant 2 : index
    %c0_39 = arith.constant 0 : index
    %c0_40 = arith.constant 0 : index
    %59 = vector.load %arg17[%c2_38, %c0_39, %c0_40] : memref<3x32x64xf32, #tpu.memory_space<vmem>>, vector<1x32x64xf32>
    %60 = vector.shape_cast %59 : vector<1x32x64xf32> to vector<32x64xf32>
    %61 = vector.shape_cast %58 : vector<32x64xf32> to vector<1x32x64xf32>
    tpu.vector_store %arg17[%c2_38, %c0_39, %c0_40], %61 {strides = array<i32>} : memref<3x32x64xf32, #tpu.memory_space<vmem>>, vector<1x32x64xf32>,
    %c0_41 = arith.constant 0 : index
    %c0_42 = arith.constant 0 : index
    %62 = vector.load %arg2[%c0_41, %c0_42] : memref<40x32xbf16, #tpu.memory_space<vmem>>, vector<40x32xbf16>
    %c0_43 = arith.constant 0 : index
    %c0_44 = arith.constant 0 : index
    %63 = vector.load %arg3[%c0_43, %c0_44] : memref<40x120xbf16, #tpu.memory_space<vmem>>, vector<40x120xbf16>
    %64 = arith.truncf %22 : vector<32x64xf32> to vector<32x64xbf16>
    %cst = arith.constant dense<0.000000e+00> : vector<40x64xf32>
    %65 = tpu.matmul %62, %64, %cst {dimension_numbers = #tpu.dot_dimension_numbers<[1], [0], [0], [1], [0, 0, 1, 1], [], []>} : vector<40x32xbf16>, vector<32x64xbf16>, vector<40x64xf32> -> vector<40x64xf32>
    %66 = arith.truncf %40 : vector<32x64xf32> to vector<32x64xbf16>
    %cst_45 = arith.constant dense<0.000000e+00> : vector<40x64xf32>
    %67 = tpu.matmul %62, %66, %cst_45 {dimension_numbers = #tpu.dot_dimension_numbers<[1], [0], [0], [1], [0, 0, 1, 1], [], []>} : vector<40x32xbf16>, vector<32x64xbf16>, vector<40x64xf32> -> vector<40x64xf32>
    %68 = arith.truncf %58 : vector<32x64xf32> to vector<32x64xbf16>
    %cst_46 = arith.constant dense<0.000000e+00> : vector<40x64xf32>
    %69 = tpu.matmul %62, %68, %cst_46 {dimension_numbers = #tpu.dot_dimension_numbers<[1], [0], [0], [1], [0, 0, 1, 1], [], []>} : vector<40x32xbf16>, vector<32x64xbf16>, vector<40x64xf32> -> vector<40x64xf32>
    %70 = tpu.concatenate %65, %67, %69 in 0 : vector<40x64xf32>, vector<40x64xf32>, vector<40x64xf32> -> vector<120x64xf32>
    %71 = arith.truncf %70 : vector<120x64xf32> to vector<120x64xbf16>
    %cst_47 = arith.constant dense<0.000000e+00> : vector<40x64xf32>
    %72 = tpu.matmul %63, %71, %cst_47 {dimension_numbers = #tpu.dot_dimension_numbers<[1], [0], [0], [1], [0, 0, 1, 1], [], []>} : vector<40x120xbf16>, vector<120x64xbf16>, vector<40x64xf32> -> vector<40x64xf32>
    %cst_48 = arith.constant 0.000000e+00 : f32
    %73 = vector.broadcast %cst_48 : f32 to vector<40x64xf32>
    %74 = arith.cmpf ogt, %72, %73 : vector<40x64xf32>
    %cst_49 = arith.constant 1.000000e-01 : f32
    %75 = vector.broadcast %cst_49 : f32 to vector<40x64xf32>
    %76 = arith.mulf %75, %72 : vector<40x64xf32>
    %77 = arith.select %74, %72, %76 : vector<40x64xi1>, vector<40x64xf32>
    %78 = arith.truncf %77 : vector<40x64xf32> to vector<40x64xbf16>
    %c0_50 = arith.constant 0 : index
    %c0_51 = arith.constant 0 : index
    %79 = vector.load %arg4[%c0_50, %c0_51] : memref<64x32xbf16, #tpu.memory_space<vmem>>, vector<64x32xbf16>
    %cst_52 = arith.constant dense<0.000000e+00> : vector<40x32xf32>
    %80 = tpu.matmul %78, %79, %cst_52 {dimension_numbers = #tpu.dot_dimension_numbers<[1], [0], [0], [1], [0, 0, 1, 1], [], []>} : vector<40x64xbf16>, vector<64x32xbf16>, vector<40x32xf32> -> vector<40x32xf32>
    %c0_53 = arith.constant 0 : index
    %c0_54 = arith.constant 0 : index
    %81 = vector.load %arg5[%c0_53, %c0_54] : memref<1x32xf32, #tpu.memory_space<vmem>>, vector<1x32xf32>
    %82 = vector.broadcast %81 : vector<1x32xf32> to vector<40x32xf32>
    %83 = arith.addf %80, %82 : vector<40x32xf32>
    %84 = arith.truncf %83 : vector<40x32xf32> to vector<40x32xbf16>
    %c0_55 = arith.constant 0 : index
    %c0_56 = arith.constant 0 : index
    %c0_57 = arith.constant 0 : index
    %85 = vector.load %arg6[%c0_55, %c0_56, %c0_57] : memref<3x32x32xbf16, #tpu.memory_space<vmem>>, vector<1x32x32xbf16>
    %86 = vector.shape_cast %85 : vector<1x32x32xbf16> to vector<32x32xbf16>
    %cst_58 = arith.constant dense<0.000000e+00> : vector<40x32xf32>
    %87 = tpu.matmul %84, %86, %cst_58 {dimension_numbers = #tpu.dot_dimension_numbers<[1], [0], [0], [1], [0, 0, 1, 1], [], []>} : vector<40x32xbf16>, vector<32x32xbf16>, vector<40x32xf32> -> vector<40x32xf32>
    %c1_59 = arith.constant 1 : index
    %c0_60 = arith.constant 0 : index
    %c0_61 = arith.constant 0 : index
    %88 = vector.load %arg6[%c1_59, %c0_60, %c0_61] : memref<3x32x32xbf16, #tpu.memory_space<vmem>>, vector<1x32x32xbf16>
    %89 = vector.shape_cast %88 : vector<1x32x32xbf16> to vector<32x32xbf16>
    %cst_62 = arith.constant dense<0.000000e+00> : vector<40x32xf32>
    %90 = tpu.matmul %84, %89, %cst_62 {dimension_numbers = #tpu.dot_dimension_numbers<[1], [0], [0], [1], [0, 0, 1, 1], [], []>} : vector<40x32xbf16>, vector<32x32xbf16>, vector<40x32xf32> -> vector<40x32xf32>
    %c2_63 = arith.constant 2 : index
    %c0_64 = arith.constant 0 : index
    %c0_65 = arith.constant 0 : index
    %91 = vector.load %arg6[%c2_63, %c0_64, %c0_65] : memref<3x32x32xbf16, #tpu.memory_space<vmem>>, vector<1x32x32xbf16>
    %92 = vector.shape_cast %91 : vector<1x32x32xbf16> to vector<32x32xbf16>
    %cst_66 = arith.constant dense<0.000000e+00> : vector<40x32xf32>
    %93 = tpu.matmul %84, %92, %cst_66 {dimension_numbers = #tpu.dot_dimension_numbers<[1], [0], [0], [1], [0, 0, 1, 1], [], []>} : vector<40x32xbf16>, vector<32x32xbf16>, vector<40x32xf32> -> vector<40x32xf32>
    %94 = tpu.concatenate %87, %90, %93 in 0 : vector<40x32xf32>, vector<40x32xf32>, vector<40x32xf32> -> vector<120x32xf32>
    %95 = arith.truncf %94 : vector<120x32xf32> to vector<120x32xbf16>
    %cst_67 = arith.constant dense<0.000000e+00> : vector<40x32xf32>
    %96 = tpu.matmul %63, %95, %cst_67 {dimension_numbers = #tpu.dot_dimension_numbers<[1], [0], [0], [1], [0, 0, 1, 1], [], []>} : vector<40x120xbf16>, vector<120x32xbf16>, vector<40x32xf32> -> vector<40x32xf32>
    %cst_68 = arith.constant 0.000000e+00 : f32
    %97 = vector.broadcast %cst_68 : f32 to vector<40x32xf32>
    %98 = arith.cmpf ogt, %96, %97 : vector<40x32xf32>
    %cst_69 = arith.constant 1.000000e-01 : f32
    %99 = vector.broadcast %cst_69 : f32 to vector<40x32xf32>
    %100 = arith.mulf %99, %96 : vector<40x32xf32>
    %101 = arith.select %98, %96, %100 : vector<40x32xi1>, vector<40x32xf32>
    %102 = arith.truncf %101 : vector<40x32xf32> to vector<40x32xbf16>
    %c0_70 = arith.constant 0 : index
    %c0_71 = arith.constant 0 : index
    %103 = vector.load %arg7[%c0_70, %c0_71] : memref<32x32xbf16, #tpu.memory_space<vmem>>, vector<32x32xbf16>
    %cst_72 = arith.constant dense<0.000000e+00> : vector<40x32xf32>
    %104 = tpu.matmul %102, %103, %cst_72 {dimension_numbers = #tpu.dot_dimension_numbers<[1], [0], [0], [1], [0, 0, 1, 1], [], []>} : vector<40x32xbf16>, vector<32x32xbf16>, vector<40x32xf32> -> vector<40x32xf32>
    %c0_73 = arith.constant 0 : index
    %c0_74 = arith.constant 0 : index
    %105 = vector.load %arg8[%c0_73, %c0_74] : memref<1x32xf32, #tpu.memory_space<vmem>>, vector<1x32xf32>
    %106 = vector.broadcast %105 : vector<1x32xf32> to vector<40x32xf32>
    %107 = arith.addf %104, %106 : vector<40x32xf32>
    %cst_75 = arith.constant 5.000000e-01 : f32
    %108 = vector.broadcast %cst_75 : f32 to vector<40x32xf32>
    %109 = arith.mulf %108, %107 : vector<40x32xf32>
    %110 = arith.addf %83, %109 : vector<40x32xf32>
    %111 = vector.extract_strided_slice %110 {offsets = [0, 0], sizes = [16, 32], strides = [1, 1]} : vector<40x32xf32> to vector<16x32xf32>
    %112 = vector.extract_strided_slice %110 {offsets = [16, 0], sizes = [24, 32], strides = [1, 1]} : vector<40x32xf32> to vector<24x32xf32>
    %c0_76 = arith.constant 0 : index
    %c0_77 = arith.constant 0 : index
    %113 = vector.load %arg15[%c0_76, %c0_77] : memref<16x32xf32, #tpu.memory_space<vmem>>, vector<16x32xf32>
    tpu.vector_store %arg15[%c0_76, %c0_77], %111 {strides = array<i32>} : memref<16x32xf32, #tpu.memory_space<vmem>>, vector<16x32xf32>,
    %c0_78 = arith.constant 0 : index
    %c0_79 = arith.constant 0 : index
    %114 = vector.load %arg16[%c0_78, %c0_79] : memref<24x32xf32, #tpu.memory_space<vmem>>, vector<24x32xf32>
    tpu.vector_store %arg16[%c0_78, %c0_79], %112 {strides = array<i32>} : memref<24x32xf32, #tpu.memory_space<vmem>>, vector<24x32xf32>,
    %c0_80 = arith.constant 0 : index
    %c0_81 = arith.constant 0 : index
    %115 = vector.load %arg11[%c0_80, %c0_81] : memref<40x16xbf16, #tpu.memory_space<vmem>>, vector<40x16xbf16>
    %116 = arith.truncf %111 : vector<16x32xf32> to vector<16x32xbf16>
    %cst_82 = arith.constant dense<0.000000e+00> : vector<40x32xf32>
    %117 = tpu.matmul %115, %116, %cst_82 {dimension_numbers = #tpu.dot_dimension_numbers<[1], [0], [0], [1], [0, 0, 1, 1], [], []>} : vector<40x16xbf16>, vector<16x32xbf16>, vector<40x32xf32> -> vector<40x32xf32>
    %c0_83 = arith.constant 0 : index
    %c0_84 = arith.constant 0 : index
    %118 = vector.load %arg12[%c0_83, %c0_84] : memref<40x24xbf16, #tpu.memory_space<vmem>>, vector<40x24xbf16>
    %119 = arith.truncf %112 : vector<24x32xf32> to vector<24x32xbf16>
    %cst_85 = arith.constant dense<0.000000e+00> : vector<40x32xf32>
    %120 = tpu.matmul %118, %119, %cst_85 {dimension_numbers = #tpu.dot_dimension_numbers<[1], [0], [0], [1], [0, 0, 1, 1], [], []>} : vector<40x24xbf16>, vector<24x32xbf16>, vector<40x32xf32> -> vector<40x32xf32>
    %121 = arith.truncf %117 : vector<40x32xf32> to vector<40x32xbf16>
    %cst_86 = arith.constant 0.000000e+00 : f32
    %122 = vector.broadcast %cst_86 : f32 to vector<40x3xf32>
    %c0_87 = arith.constant 0 : index
    %c0_88 = arith.constant 0 : index
    %c0_89 = arith.constant 0 : index
    %123 = vector.load %arg9[%c0_87, %c0_88, %c0_89] : memref<2x32x32xbf16, #tpu.memory_space<vmem>>, vector<1x32x32xbf16>
    %124 = vector.shape_cast %123 : vector<1x32x32xbf16> to vector<32x32xbf16>
    %cst_90 = arith.constant dense<0.000000e+00> : vector<40x32xf32>
    %125 = tpu.matmul %121, %124, %cst_90 {dimension_numbers = #tpu.dot_dimension_numbers<[1], [0], [0], [1], [0, 0, 1, 1], [], []>} : vector<40x32xbf16>, vector<32x32xbf16>, vector<40x32xf32> -> vector<40x32xf32>
    %126 = arith.mulf %125, %120 : vector<40x32xf32>
    %cst_91 = arith.constant dense<0.000000e+00> : vector<40xf32>
    %127 = vector.multi_reduction <add>, %126, %cst_91 [1] : vector<40x32xf32> to vector<40xf32>
    %128 = vector.shape_cast %127 : vector<40xf32> to vector<40x1xf32>
    %c0_92 = arith.constant 0 : index
    %c0_93 = arith.constant 0 : index
    %c0_94 = arith.constant 0 : index
    %129 = vector.load %arg10[%c0_92, %c0_93, %c0_94] : memref<2x1x3xf32, #tpu.memory_space<vmem>>, vector<1x1x3xf32>
    %130 = vector.shape_cast %129 : vector<1x1x3xf32> to vector<1x3xf32>
    %131 = vector.broadcast %128 : vector<40x1xf32> to vector<40x3xf32>
    %132 = vector.broadcast %130 : vector<1x3xf32> to vector<40x3xf32>
    %133 = arith.mulf %131, %132 : vector<40x3xf32>
    %134 = arith.addf %122, %133 : vector<40x3xf32>
    %c1_95 = arith.constant 1 : index
    %c0_96 = arith.constant 0 : index
    %c0_97 = arith.constant 0 : index
    %135 = vector.load %arg9[%c1_95, %c0_96, %c0_97] : memref<2x32x32xbf16, #tpu.memory_space<vmem>>, vector<1x32x32xbf16>
    %136 = vector.shape_cast %135 : vector<1x32x32xbf16> to vector<32x32xbf16>
    %cst_98 = arith.constant dense<0.000000e+00> : vector<40x32xf32>
    %137 = tpu.matmul %121, %136, %cst_98 {dimension_numbers = #tpu.dot_dimension_numbers<[1], [0], [0], [1], [0, 0, 1, 1], [], []>} : vector<40x32xbf16>, vector<32x32xbf16>, vector<40x32xf32> -> vector<40x32xf32>
    %138 = arith.mulf %137, %120 : vector<40x32xf32>
    %cst_99 = arith.constant dense<0.000000e+00> : vector<40xf32>
    %139 = vector.multi_reduction <add>, %138, %cst_99 [1] : vector<40x32xf32> to vector<40xf32>
    %140 = vector.shape_cast %139 : vector<40xf32> to vector<40x1xf32>
    %c1_100 = arith.constant 1 : index
    %c0_101 = arith.constant 0 : index
    %c0_102 = arith.constant 0 : index
    %141 = vector.load %arg10[%c1_100, %c0_101, %c0_102] : memref<2x1x3xf32, #tpu.memory_space<vmem>>, vector<1x1x3xf32>
    %142 = vector.shape_cast %141 : vector<1x1x3xf32> to vector<1x3xf32>
    %143 = vector.broadcast %140 : vector<40x1xf32> to vector<40x3xf32>
    %144 = vector.broadcast %142 : vector<1x3xf32> to vector<40x3xf32>
    %145 = arith.mulf %143, %144 : vector<40x3xf32>
    %146 = arith.addf %134, %145 : vector<40x3xf32>
    %c0_103 = arith.constant 0 : index
    %c0_104 = arith.constant 0 : index
    %147 = vector.load %arg13[%c0_103, %c0_104] : memref<40x3xf32, #tpu.memory_space<vmem>>, vector<40x3xf32>
    tpu.vector_store %arg13[%c0_103, %c0_104], %146 {strides = array<i32>} : memref<40x3xf32, #tpu.memory_space<vmem>>, vector<40x3xf32>,
    %cst_105 = arith.constant 0.000000e+00 : f32
    %148 = vector.broadcast %cst_105 : f32 to vector<1x1xf32>
    %149 = arith.mulf %40, %22 : vector<32x64xf32>
    %cst_106 = arith.constant dense<0.000000e+00> : vector<32xf32>
    %150 = vector.multi_reduction <add>, %149, %cst_106 [1] : vector<32x64xf32> to vector<32xf32>
    %151 = vector.shape_cast %150 : vector<32xf32> to vector<32x1xf32>
    %152 = arith.mulf %40, %40 : vector<32x64xf32>
    %cst_107 = arith.constant dense<0.000000e+00> : vector<32xf32>
    %153 = vector.multi_reduction <add>, %152, %cst_107 [1] : vector<32x64xf32> to vector<32xf32>
    %154 = vector.shape_cast %153 : vector<32xf32> to vector<32x1xf32>
    %155 = math.sqrt %154 : vector<32x1xf32>
    %156 = arith.mulf %22, %22 : vector<32x64xf32>
    %cst_108 = arith.constant dense<0.000000e+00> : vector<32xf32>
    %157 = vector.multi_reduction <add>, %156, %cst_108 [1] : vector<32x64xf32> to vector<32xf32>
    %158 = vector.shape_cast %157 : vector<32xf32> to vector<32x1xf32>
    %159 = math.sqrt %158 : vector<32x1xf32>
    %cst_109 = arith.constant 9.99999993E-9 : f32
    %160 = vector.broadcast %cst_109 : f32 to vector<32x1xf32>
    %161 = arith.maximumf %155, %160 : vector<32x1xf32>
    %cst_110 = arith.constant 9.99999993E-9 : f32
    %162 = vector.broadcast %cst_110 : f32 to vector<32x1xf32>
    %163 = arith.maximumf %159, %162 : vector<32x1xf32>
    %164 = arith.mulf %161, %163 : vector<32x1xf32>
    %165 = arith.divf %151, %164 : vector<32x1xf32>
    %166 = vector.shape_cast %165 : vector<32x1xf32> to vector<1x32x1xf32>
    %cst_111 = arith.constant dense<0.000000e+00> : vector<1xf32>
    %167 = vector.multi_reduction <add>, %166, %cst_111 [1, 2] : vector<1x32x1xf32> to vector<1xf32>
    %168 = vector.shape_cast %167 : vector<1xf32> to vector<1x1x1xf32>
    %169 = vector.extract %168[0, 0, 0] : f32 from vector<1x1x1xf32>
    %170 = vector.broadcast %169 : f32 to vector<1x1xf32>
    %171 = arith.subf %148, %170 : vector<1x1xf32>
    %172 = arith.mulf %58, %40 : vector<32x64xf32>
    %cst_112 = arith.constant dense<0.000000e+00> : vector<32xf32>
    %173 = vector.multi_reduction <add>, %172, %cst_112 [1] : vector<32x64xf32> to vector<32xf32>
    %174 = vector.shape_cast %173 : vector<32xf32> to vector<32x1xf32>
    %175 = arith.mulf %58, %58 : vector<32x64xf32>
    %cst_113 = arith.constant dense<0.000000e+00> : vector<32xf32>
    %176 = vector.multi_reduction <add>, %175, %cst_113 [1] : vector<32x64xf32> to vector<32xf32>
    %177 = vector.shape_cast %176 : vector<32xf32> to vector<32x1xf32>
    %178 = math.sqrt %177 : vector<32x1xf32>
    %179 = arith.mulf %40, %40 : vector<32x64xf32>
    %cst_114 = arith.constant dense<0.000000e+00> : vector<32xf32>
    %180 = vector.multi_reduction <add>, %179, %cst_114 [1] : vector<32x64xf32> to vector<32xf32>
    %181 = vector.shape_cast %180 : vector<32xf32> to vector<32x1xf32>
    %182 = math.sqrt %181 : vector<32x1xf32>
    %cst_115 = arith.constant 9.99999993E-9 : f32
    %183 = vector.broadcast %cst_115 : f32 to vector<32x1xf32>
    %184 = arith.maximumf %178, %183 : vector<32x1xf32>
    %cst_116 = arith.constant 9.99999993E-9 : f32
    %185 = vector.broadcast %cst_116 : f32 to vector<32x1xf32>
    %186 = arith.maximumf %182, %185 : vector<32x1xf32>
    %187 = arith.mulf %184, %186 : vector<32x1xf32>
    %188 = arith.divf %174, %187 : vector<32x1xf32>
    %189 = vector.shape_cast %188 : vector<32x1xf32> to vector<1x32x1xf32>
    %cst_117 = arith.constant dense<0.000000e+00> : vector<1xf32>
    %190 = vector.multi_reduction <add>, %189, %cst_117 [1, 2] : vector<1x32x1xf32> to vector<1xf32>
    %191 = vector.shape_cast %190 : vector<1xf32> to vector<1x1x1xf32>
    %192 = vector.extract %191[0, 0, 0] : f32 from vector<1x1x1xf32>
    %193 = vector.broadcast %192 : f32 to vector<1x1xf32>
    %194 = arith.subf %171, %193 : vector<1x1xf32>
    %c0_118 = arith.constant 0 : index
    %c0_119 = arith.constant 0 : index
    %195 = vector.load %arg14[%c0_118, %c0_119] : memref<1x1xf32, #tpu.memory_space<vmem>>, vector<1x1xf32>
    tpu.vector_store %arg14[%c0_118, %c0_119], %194 {strides = array<i32>} : memref<1x1xf32, #tpu.memory_space<vmem>>, vector<1x1xf32>,
    return
  }
}

</mosaic_0001>

<bundles_post_ra>
// kernel: net_forward.1
= control target key start
LH: loop header
LB: loop body
LE: loop exit
PB: predicated region body
PF: predicated region fallthrough
CT: control target
= control target key end

     0   :  { %s3356_s0 = inlined_call_operand.vmem [shape: f32[3,4], index: 0, kind: input, shape index: {}]   ;;  %s3357_s1 = inlined_call_operand.vmem [shape: f32[4,32,64], index: 1, kind: input, shape index: {}]   ;;  %s3358_s2 = inlined_call_operand.vmem [shape: bf16[40,32], index: 2, kind: input, shape index: {}]   ;;  %s3359_s3 = inlined_call_operand.vmem [shape: bf16[40,120], index: 3, kind: input, shape index: {}]   ;;  %s3360_s4 = inlined_call_operand.vmem [shape: bf16[64,32], index: 4, kind: input, shape index: {}]   ;;  %s3361_s5 = inlined_call_operand.vmem [shape: f32[1,32], index: 5, kind: input, shape index: {}]   ;;  %s3362_s6 = inlined_call_operand.vmem [shape: bf16[3,32,32], index: 6, kind: input, shape index: {}]   ;;  %s3363_s7 = inlined_call_operand.vmem [shape: bf16[32,32], index: 7, kind: input, shape index: {}]   ;;  %s3364_s8 = inlined_call_operand.vmem [shape: f32[1,32], index: 8, kind: input, shape index: {}]   ;;  %s3365_s9 = inlined_call_operand.vmem [shape: bf16[2,32,32], index: 9, kind: input, shape index: {}]   ;;  %s3366_s10 = inlined_call_operand.vmem [shape: f32[2,1,3], index: 10, kind: input, shape index: {}]   ;;  %s3367_s11 = inlined_call_operand.vmem [shape: bf16[40,16], index: 11, kind: input, shape index: {}]   ;;  %s3368_s12 = inlined_call_operand.vmem [shape: bf16[40,24], index: 12, kind: input, shape index: {}]   ;;  %s3369_s13 = inlined_call_operand.vmem [shape: f32[40,3], index: 13, kind: output, shape index: {0}]   ;;  %s3370_s14 = inlined_call_operand.hbm [shape: f32[1,1], index: 14, kind: output, shape index: {1}]   ;;  %s3371_s15 = inlined_call_operand.hbm [shape: f32[16,32], index: 15, kind: output, shape index: {2}]   ;;  %s3372_s16 = inlined_call_operand.hbm [shape: f32[24,32], index: 16, kind: output, shape index: {3}]   ;;  %s3373_s17 = inlined_call_operand.hbm [shape: f32[3,32,64], index: 17, kind: output, shape index: {4}]  }
   0x1   :  { %3379 = sst [smem:[#allocation15_spill]] %s3356_s0 }
   0x2   :  { %3380 = sst [smem:[#allocation16_spill]] %s3357_s1 }
   0x3   :  { %3381 = sst [smem:[#allocation17_spill]] %s3366_s10 }
   0x4   :  { %3382 = sst [smem:[#allocation18_spill]] %s3369_s13 }
   0x5   :  { %3383 = sst [smem:[#allocation19_spill]] %s3372_s16 }
   0x6   :  { %3384 = sst [smem:[#allocation20_spill]] %s3373_s17 }
   0x7   :  { %23 = vsyncpa [#allocation4], 0 }
   0x8   :  { %24 = vsyncpa [#allocation3], 0 }
   0x9   :  { %25 = vsyncpa [#allocation7], 0 }
   0xa   :  { %26 = vsyncpa [#allocation10], 0  ;;  %s3385_s26 = sld [smem:[#allocation15_spill]] }
  0x10   :  { %s33_s27 = sshll.u32 %s3385_s26, 4  ;;  %s34_s27 = int_to_ptr.vmem [resolvable:$true] %s33_s27 }
  0x11   :  { %s2287_s28 = scalar_lea.vmem %s34_s27, 64  ;;  %p2292_p1 = scmp.lt.s32.totalorder %s34_s27, %s34_s27 }
  0x12   :  { %p2288_p0 = scmp.ne.s32.totalorder %s34_s27, %s2287_s28  ;;  %p2293_p2 = scmp.lt.s32.totalorder %s2287_s28, %s2287_s28 }
  0x14   :  { %p2294_p3 = por %p2293_p2, %p2292_p1 }
  0x16   :  { %p2295_p4 = pnand %p2294_p3, %p2288_p0 }
  0x18   :  { %2298 = shalt.err (!%p2295_p4)
}
  0x19   :  { %s2395_s29 = smov [#allocation2]  }
  0x1a   :  { %36 = dma.vmem_to_smem %s34_s27, 64, %s2395_s29, [#allocation4]  }
  0x1b   :  { %2387 = dma.done.wait [#allocation4], 64  }
  0x1c   :  { %2388 = vsyncadd [#allocation4], 4294967232 }
  0x1d   :  { %64 = sfence }
  0x1e   :  { %s85_s0 = sld [smem:[#allocation2]]  ;;  %v2396_v0 = vmov 0.0   ;;  %s1775_s30 = sld [smem:[#allocation2 + $0x1]]  ;;  %vm2397_vm0 = vmmov 0   ;;  %vm121_vm1 = vcmask 523264   ;;  %vm233_vm2 = vcmask 261120  }
  0x1f   :  { %1956 = vmatprep.subr.bf16.mxu0 %v2396_v0  ;;  %1972 = vmatprep.subr.bf16.mxu1 %v2396_v0  ;;  %s1776_s18 = sld [smem:[#allocation2 + $0x2]]  ;;  %s1777_s19 = sld [smem:[#allocation2 + $0x3]]  ;;  %vm446_vm3 = vcmask 1043456   ;;  %vm436_vm4 = vcmask 982016   ;;  %vm1065_vm15 = vcmask 130048  }
  0x20   :  { %s3386_s21 = sld [smem:[#allocation16_spill]]  ;;  %s2504_s22 = sld [smem:[#allocation2 + $0x100]]  ;;  %1960 = vmatprep.mubr.msk.bf16.mxu0 %vm2397_vm0, %v2396_v0  ;;  %1976 = vmatprep.mubr.msk.bf16.mxu1 %vm2397_vm0, %v2396_v0 }
  0x21   :  { %s2506_s23 = sld [smem:[#allocation2 + $0x101]]  ;;  %s2513_s26 = sld [smem:[#allocation2 + $0x102]] }
  0x22   :  { %s2515_s27 = sld [smem:[#allocation2 + $0x103]]  ;;  %s2561_s10 = sld [smem:[#allocation2 + $0x80]] }
  0x23   :  { %s2398_s24 = smov [#allocation6]  }
  0x24   :  { %v86_v10 = vstv %s85_s0  ;;  %v92_v13 = vstv %s1775_s30  ;;  %s2577_s30 = sld [smem:[#allocation2 + $0x81]] }
  0x25   :  { %v102_v17 = vstv %s1776_s18  ;;  %v112_v18 = vstv %s1777_s19  ;;  %s2579_s18 = sld [smem:[#allocation2 + $0x82]] }
  0x26   :  { %v2502_v1 = vld [vmem:[%s3386_s21] sm:$0xff]  ;;  %v2511_v2 = vld [vmem:[%s3386_s21 + $0x8] sm:$0xff]  ;;  %v2520_v3 = vld [vmem:[%s3386_s21 + $0x10] sm:$0xff]  ;;  %v2582_v27 = vstv %s2504_s22 }
  0x27   :  { %v2525_v4 = vld [vmem:[%s3386_s21 + $0x20] sm:$0xff]  ;;  %v2530_v5 = vld [vmem:[%s3386_s21 + $0x28] sm:$0xff]  ;;  %v87_v11 = vmul.f32 %v86_v10, %v2502_v1  ;;  %v88_v12 = vmul.f32 %v86_v10, %v2511_v2  ;;  %v89_v14 = vmul.f32 %v86_v10, %v2520_v3  ;;  %v2570_v23 = vld [vmem:[%s3386_s21 + $0x18] sm:$0xff]  ;;  %v2585_v28 = vstv %s2506_s23  ;;  %s2607_s23 = sld [smem:[#allocation2 + $0x83]] }
  0x28   :  { %v2535_v6 = vld [vmem:[%s3386_s21 + $0x40] sm:$0xff]  ;;  %v2540_v7 = vld [vmem:[%s3386_s21 + $0x48] sm:$0xff]  ;;  %v93_v15 = vmul.f32 %v2525_v4, %v92_v13  ;;  %v94_v16 = vmul.f32 %v2530_v5, %v92_v13  ;;  %v2575_v24 = vld [vmem:[%s3386_s21 + $0x30] sm:$0xff]  ;;  %v2611_v33 = vmul.f32 %v2582_v27, %v2502_v1  ;;  %v2615_v34 = vmul.f32 %v2582_v27, %v2511_v2 }
  0x29   :  { %v2545_v8 = vld [vmem:[%s3386_s21 + $0x60] sm:$0xff]  ;;  %v2550_v9 = vld [vmem:[%s3386_s21 + $0x68] sm:$0xff]  ;;  %v103_v19 = vmul.f32 %v2535_v6, %v102_v17  ;;  %v104_v20 = vmul.f32 %v2540_v7, %v102_v17  ;;  %v2590_v29 = vld [vmem:[%s3386_s21 + $0x38] sm:$0xff]  ;;  %v2619_v35 = vmul.f32 %v2525_v4, %v2585_v28  ;;  %v2623_v36 = vmul.f32 %v2530_v5, %v2585_v28 }
  0x2a   :  { %v113_v21 = vmul.f32 %v2545_v8, %v112_v18  ;;  %v114_v22 = vmul.f32 %v2550_v9, %v112_v18  ;;  %v97_v25 = vadd.f32 %v93_v15, %v87_v11  ;;  %v98_v26 = vadd.f32 %v94_v16, %v88_v12  ;;  %v2595_v30 = vld [vmem:[%s3386_s21 + $0x50] sm:$0xff]  ;;  %v2600_v31 = vld [vmem:[%s3386_s21 + $0x58] sm:$0xff] }
  0x2b   :  { %v2605_v32 = vld [vmem:[%s3386_s21 + $0x70] sm:$0xff]  ;;  %v2628_v37 = vld [vmem:[%s3386_s21 + $0x78] sm:$0xff]  ;;  %v2631_v40 = vstv %s2513_s26  ;;  %v2634_v41 = vstv %s2515_s27  ;;  %v90_v48 = vmul.f32 %v86_v10, %v2570_v23  ;;  %v95_v49 = vmul.f32 %v2575_v24, %v92_v13 }
  0x2c   :  { %v107_v38 = vadd.f32 %v103_v19, %v97_v25  ;;  %v108_v39 = vadd.f32 %v104_v20, %v98_v26  ;;  %v2638_v42 = vmul.f32 %v2535_v6, %v2631_v40  ;;  %v2642_v43 = vmul.f32 %v2540_v7, %v2631_v40 }
  0x2d   :  { %v2646_v44 = vmul.f32 %v2545_v8, %v2634_v41  ;;  %v2650_v45 = vmul.f32 %v2550_v9, %v2634_v41  ;;  %v96_v50 = vmul.f32 %v2590_v29, %v92_v13  ;;  %v105_v51 = vmul.f32 %v2595_v30, %v102_v17 }
  0x2e   :  { %v2652_v46 = vadd.f32 %v113_v21, %v107_v38  ;;  %v2654_v47 = vadd.f32 %v114_v22, %v108_v39  ;;  %v106_v52 = vmul.f32 %v2600_v31, %v102_v17  ;;  %v115_v53 = vmul.f32 %v2605_v32, %v112_v18 }
  0x2f   :  { %v99_v55 = vadd.f32 %v95_v49, %v89_v14  ;;  %v116_v56 = vmul.f32 %v2628_v37, %v112_v18  ;;  %v127_v57 = vstv %s2561_s10  ;;  %v100_v58 = vadd.f32 %v96_v50, %v90_v48 }
  0x30   :  { %122 = vst.msk [vmem:[#allocation9] sm:$0xff] %vm121_vm1, %v2652_v46  ;;  %123 = vst.msk [vmem:[#allocation9 + $0x8] sm:$0xff] %vm121_vm1, %v2654_v47  ;;  %v218_v54 = vpack.c.bf16 %v2654_v47, %v2652_v46  ;;  %v128_v59 = vmul.f32 %v127_v57, %v2502_v1  ;;  %v129_v60 = vmul.f32 %v127_v57, %v2511_v2  ;;  %v133_v61 = vstv %s2577_s30 }
  0x31   :  { %v109_v62 = vadd.f32 %v105_v51, %v99_v55  ;;  %v134_v63 = vmul.f32 %v2525_v4, %v133_v61  ;;  %v135_v10 = vmul.f32 %v2530_v5, %v133_v61  ;;  %v143_v11 = vstv %s2579_s18 }
  0x32   :  { %1957 = vmatpush3.bf16.msra.mxu0 %v218_v54  ;;  %v110_v12 = vadd.f32 %v106_v52, %v100_v58  ;;  %v144_v13 = vmul.f32 %v2535_v6, %v143_v11  ;;  %v145_v14 = vmul.f32 %v2540_v7, %v143_v11  ;;  %v153_v15 = vstv %s2607_s23  ;;  %v2692_v7 = vld [vmem:[%s3358_s2] sm:$0xff]  }
  0x33   :  { %1958 = vmatprep.subr.bf16.mxu0 %v2396_v0  ;;  %v2680_v16 = vadd.f32 %v115_v53, %v109_v62  ;;  %v138_v1 = vadd.f32 %v134_v63, %v128_v59  ;;  %v139_v2 = vadd.f32 %v135_v10, %v129_v60  ;;  %v154_v17 = vmul.f32 %v2545_v8, %v153_v15  ;;  %v2226_v62 = vld [vmem:[%s3360_s4 + $0x8] sm:$0xff]  }
  0x34   :  { %v2683_v18 = vadd.f32 %v116_v56, %v110_v12  ;;  %v155_v4 = vmul.f32 %v2550_v9, %v153_v15  ;;  %v130_v5 = vmul.f32 %v127_v57, %v2520_v3  ;;  %v131_v20 = vmul.f32 %v127_v57, %v2570_v23 }
  0x35   :  { %124 = vst.msk [vmem:[#allocation9 + $0x10] sm:$0xff] %vm121_vm1, %v2680_v16  ;;  %v148_v6 = vadd.f32 %v144_v13, %v138_v1  ;;  %v149_v19 = vadd.f32 %v145_v14, %v139_v2  ;;  %v136_v8 = vmul.f32 %v2575_v24, %v133_v61  ;;  %v137_v21 = vmul.f32 %v2590_v29, %v133_v61  ;;  %v2225_v61 = vld [vmem:[%s3360_s4] sm:$0xff]  }
  0x36   :  { %125 = vst.msk [vmem:[#allocation9 + $0x18] sm:$0xff] %vm121_vm1, %v2683_v18  ;;  %v219_v9 = vpack.c.bf16 %v2683_v18, %v2680_v16  ;;  %v146_v22 = vmul.f32 %v2595_v30, %v143_v11  ;;  %v147_v25 = vmul.f32 %v2600_v31, %v143_v11  ;;  %v156_v48 = vmul.f32 %v2605_v32, %v153_v15 }
  0x37   :  { %v2703_v26 = vadd.f32 %v154_v17, %v148_v6  ;;  %v2705_v38 = vadd.f32 %v155_v4, %v149_v19  ;;  %v140_v39 = vadd.f32 %v136_v8, %v130_v5  ;;  %v141_v49 = vadd.f32 %v137_v21, %v131_v20 }
  0x38   :  { %1959 = vmatpush3.bf16.msra.mxu0 %v219_v9  ;;  %v157_v50 = vmul.f32 %v2628_v37, %v153_v15  ;;  %v179_v51 = vadd.f32 %v2619_v35, %v2611_v33  ;;  %v180_v52 = vadd.f32 %v2623_v36, %v2615_v34  ;;  %v171_v55 = vmul.f32 %v2582_v27, %v2520_v3 }
  0x39   :  { %163 = vst.msk [vmem:[#allocation9 + $0x20] sm:$0xff] %vm121_vm1, %v2703_v26  ;;  %164 = vst.msk [vmem:[#allocation9 + $0x28] sm:$0xff] %vm121_vm1, %v2705_v38  ;;  %v299_v53 = vpack.c.bf16 %v2705_v38, %v2703_v26  ;;  %v150_v54 = vadd.f32 %v146_v22, %v140_v39  ;;  %1988 = vmatprep.subr.bf16.mxu0 %v2396_v0  ;;  %v172_v33 = vmul.f32 %v2582_v27, %v2570_v23 }
  0x3a   :  { %v151_v35 = vadd.f32 %v147_v25, %v141_v49  ;;  %v189_v34 = vadd.f32 %v2638_v42, %v179_v51  ;;  %v190_v36 = vadd.f32 %v2642_v43, %v180_v52  ;;  %v177_v56 = vmul.f32 %v2575_v24, %v2585_v28 }
  0x3b   :  { %1973 = vmatpush3.bf16.msra.mxu1 %v299_v53  ;;  %1961 = vmatmul.mubr.msk.bf16.vlgmr.msra.gmra.mrb[0].mxu0 %vm233_vm2, %v2692_v7  ;;  %v2730_v57 = vadd.f32 %v156_v48, %v150_v54  ;;  %v178_v3 = vmul.f32 %v2590_v29, %v2585_v28  ;;  %v187_v23 = vmul.f32 %v2595_v30, %v2631_v40 }
  0x3c   :  { %1974 = vmatprep.subr.bf16.mxu1 %v2396_v0  ;;  %v2737_v27 = vadd.f32 %v157_v50, %v151_v35  ;;  %1964 = vmatprep.mubr.msk.bf16.mxu0 %vm2397_vm0, %v2396_v0  ;;  %v2742_v24 = vadd.f32 %v2646_v44, %v189_v34  ;;  %v2745_v42 = vadd.f32 %v2650_v45, %v190_v36 }
  0x3d   :  { %165 = vst.msk [vmem:[#allocation9 + $0x30] sm:$0xff] %vm121_vm1, %v2730_v57  ;;  %v181_v28 = vadd.f32 %v177_v56, %v171_v55  ;;  %v182_v29 = vadd.f32 %v178_v3, %v172_v33  ;;  %v188_v30 = vmul.f32 %v2600_v31, %v2631_v40  ;;  %v197_v43 = vmul.f32 %v2605_v32, %v2634_v41  ;;  %v2220_v32 = vld [vmem:[%s3358_s2 + $0x8] sm:$0xff]  }
  0x3e   :  { %166 = vst.msk [vmem:[#allocation9 + $0x38] sm:$0xff] %vm121_vm1, %v2737_v27  ;;  %v300_v44 = vpack.c.bf16 %v2737_v27, %v2730_v57  ;;  %204 = vst.msk [vmem:[#allocation9 + $0x40] sm:$0xff] %vm121_vm1, %v2742_v24  ;;  %v357_v45 = vpack.c.bf16 %v2745_v42, %v2742_v24  ;;  %v198_v31 = vmul.f32 %v2628_v37, %v2634_v41  ;;  %v2221_v41 = vld [vmem:[%s3358_s2 + $0x10] ss:$0 sps:$4 sm:$0xff]  }
  0x3f   :  { %205 = vst.msk [vmem:[#allocation9 + $0x48] sm:$0xff] %vm121_vm1, %v2745_v42  ;;  %v191_v40 = vadd.f32 %v187_v23, %v181_v28  ;;  %v192_v58 = vadd.f32 %v188_v30, %v182_v29 }
  0x40   :  { %1975 = vmatpush3.bf16.msra.mxu1 %v300_v44  ;;  %1989 = vmatpush3.bf16.msra.mxu0 %v357_v45 }
  0x41   :  { %1990 = vmatprep.subr.bf16.mxu0 %v2396_v0  ;;  %v2769_v59 = vadd.f32 %v197_v43, %v191_v40  ;;  %v2771_v60 = vadd.f32 %v198_v31, %v192_v58  ;;  %2004 = vmatprep.subr.bf16.mxu1 %v2396_v0  ;;  %v2829_v40 = vld [vmem:[%s3359_s3] sm:$0xff]   ;;  %v2839_v58 = vld [vmem:[%s3359_s3 + $0x8] sm:$0xff]  }
  0x43   :  { %1977 = vmatmul.mubr.msk.bf16.vlgmr.msra.gmra.mrb[0].mxu1 %vm233_vm2, %v2692_v7  ;;  %1965 = vmatmul.mubr.msk.bf16.gmra.mrb[4].mxu0 %vm233_vm2, %v2220_v32  ;;  %206 = vst.msk [vmem:[#allocation9 + $0x50] sm:$0xff] %vm121_vm1, %v2769_v59  ;;  %207 = vst.msk [vmem:[#allocation9 + $0x58] sm:$0xff] %vm121_vm1, %v2771_v60  ;;  %v358_v37 = vpack.c.bf16 %v2771_v60, %v2769_v59 }
  0x44   :  { %1980 = vmatprep.mubr.msk.bf16.mxu1 %vm2397_vm0, %v2396_v0  ;;  %1968 = vmatprep.mubr.msk.bf16.mxu0 %vm2397_vm0, %v2396_v0 }
  0x45   :  { %1991 = vmatpush3.bf16.msra.mxu0 %v358_v37  ;;  %v2848_v37 = vld [vmem:[%s3359_s3 + $0x10] ss:$0 sps:$4 sm:$0xff]  }
  0x46   :  { %2032 = vmatprep.subr.bf16.mxu0 %v2396_v0 }
  0x4b   :  { %1981 = vmatmul.mubr.msk.bf16.gmra.mrb[4].mxu1 %vm233_vm2, %v2220_v32  ;;  %1969 = vmatmul.mubr.msk.bf16.gmra.mrb[8].mxu0 %vm233_vm2, %v2221_v41 }
  0x4c   :  { %1984 = vmatprep.mubr.msk.bf16.mxu1 %vm2397_vm0, %v2396_v0  ;;  %1992 = vmatprep.mubr.msk.bf16.mxu0 %vm2397_vm0, %v2396_v0 }
  0x53   :  { %1985 = vmatmul.mubr.msk.bf16.gmra.mrb[8].mxu1 %vm233_vm2, %v2221_v41  ;;  %1993 = vmatmul.mubr.msk.bf16.vlgmr.msra.gmra.mrb[12].mxu0 %vm233_vm2, %v2692_v7 }
  0x54   :  { %1996 = vmatprep.mubr.msk.bf16.mxu0 %vm2397_vm0, %v2396_v0  ;;  %2020 = vmatprep.mubr.msk.bf16.mxu1 %vm2397_vm0, %v2396_v0 }
  0x55   :  { %2033 = vmatpush3.bf16.msra.mxu0 %v2225_v61  ;;  %v2228_v61 = vld [vmem:[%s3360_s4 + $0x18] sm:$0xff]  }
  0x56   :  { %2034 = vmatprep.subr.bf16.mxu0 %v2396_v0 }
  0x59   :  { %2035 = vmatpush3.bf16.msra.mxu0 %v2226_v62 }
  0x5a   :  { %2036 = vmatprep.subr.bf16.mxu0 %v2396_v0 }
  0x5b   :  { %1997 = vmatmul.mubr.msk.bf16.gmra.mrb[16].mxu0 %vm233_vm2, %v2220_v32 }
  0x5c   :  { %2000 = vmatprep.mubr.msk.bf16.mxu0 %vm2397_vm0, %v2396_v0 }
  0x63   :  { %2001 = vmatmul.mubr.msk.bf16.gmra.mrb[20].mxu0 %vm233_vm2, %v2221_v41  ;;  %v2227_v41 = vld [vmem:[%s3360_s4 + $0x10] sm:$0xff]  }
  0x64   :  { %2040 = vmatprep.mubr.msk.bf16.mxu0 %vm2397_vm0, %v2396_v0  ;;  %2037 = vmatpush3.bf16.msra.mxu0 %v2227_v41 }
  0x65   :  { %2038 = vmatprep.subr.bf16.mxu0 %v2396_v0 }
  0x68   :  { %2039 = vmatpush3.bf16.msra.mxu0 %v2228_v61 }
  0x69   :  { %2068 = vmatprep.subr.bf16.mxu0 %v2396_v0 }
 0x10e   :  { %v277_v63 = vpop.f32.mrb[0].mxu0 }
 0x10f   :  { %v1962_v10 = vpop.f32.mrb[1].mxu0 }
 0x110   :  { %v280_v11 = vpop.f32.mrb[2].mxu0 }
 0x111   :  { %v415_v12 = vpack.c.bf16 %v280_v11, %v277_v63  ;;  %v1963_v13 = vpop.f32.mrb[3].mxu0 }
 0x113   :  { %2005 = vmatpush3.bf16.msra.mxu1 %v415_v12 }
 0x114   :  { %2006 = vmatprep.subr.bf16.mxu1 %v2396_v0 }
 0x116   :  { %v285_v14 = vpop.f32.mrb[4].mxu0  ;;  %v335_v15 = vpop.f32.mrb[0].mxu1 }
 0x117   :  { %v1966_v1 = vpop.f32.mrb[5].mxu0  ;;  %v1978_v2 = vpop.f32.mrb[1].mxu1 }
 0x118   :  { %v288_v17 = vpop.f32.mrb[6].mxu0  ;;  %v338_v4 = vpop.f32.mrb[2].mxu1 }
 0x119   :  { %v416_v5 = vpack.c.bf16 %v288_v17, %v285_v14  ;;  %v1967_v6 = vpop.f32.mrb[7].mxu0  ;;  %v1979_v19 = vpop.f32.mrb[3].mxu1 }
 0x11b   :  { %2007 = vmatpush3.bf16.msra.mxu1 %v416_v5 }
 0x11c   :  { %2008 = vmatprep.subr.bf16.mxu1 %v2396_v0 }
 0x11e   :  { %v343_v7 = vpop.f32.mrb[4].mxu1  ;;  %v293_v20 = vpop.f32.mrb[8].mxu0 }
 0x11f   :  { %v418_v8 = vpack.c.bf16 %v343_v7, %v338_v4  ;;  %v417_v9 = vpack.c.bf16 %v335_v15, %v293_v20  ;;  %v1970_v21 = vpop.f32.mrb[9].mxu0  ;;  %v1982_v22 = vpop.f32.mrb[5].mxu1 }
 0x120   :  { %v296_v25 = vpop.f32.mrb[10].mxu0  ;;  %v346_v39 = vpop.f32.mrb[6].mxu1 }
 0x121   :  { %v1971_v48 = vpop.f32.mrb[11].mxu0  ;;  %2009 = vmatpush3.bf16.msra.mxu1 %v417_v9  ;;  %v1983_v49 = vpop.f32.mrb[7].mxu1 }
 0x122   :  { %2010 = vmatprep.subr.bf16.mxu1 %v2396_v0 }
 0x125   :  { %2011 = vmatpush3.bf16.msra.mxu1 %v418_v8 }
 0x126   :  { %v351_v50 = vpop.f32.mrb[8].mxu1  ;;  %v393_v51 = vpop.f32.mrb[12].mxu0  ;;  %2012 = vmatprep.subr.bf16.mxu1 %v2396_v0 }
 0x127   :  { %v419_v52 = vpack.c.bf16 %v351_v50, %v346_v39  ;;  %v1994_v53 = vpop.f32.mrb[13].mxu0  ;;  %v1986_v54 = vpop.f32.mrb[9].mxu1  ;;  %v2229_v50 = vld [vmem:[%s3362_s6] sm:$0xff]  }
 0x128   :  { %v396_v55 = vpop.f32.mrb[14].mxu0  ;;  %v354_v33 = vpop.f32.mrb[10].mxu1  ;;  %v2232_v53 = vld [vmem:[%s3362_s6 + $0x18] sm:$0xff]   ;;  %v1804_v54 = vld [vmem:[%s3361_s5] ss:$0 sm:$0xff] }
 0x129   :  { %v420_v35 = vpack.c.bf16 %v396_v55, %v393_v51  ;;  %v1995_v34 = vpop.f32.mrb[15].mxu0  ;;  %2013 = vmatpush3.bf16.msra.mxu1 %v419_v52  ;;  %v1987_v36 = vpop.f32.mrb[11].mxu1  ;;  %v2230_v51 = vld [vmem:[%s3362_s6 + $0x10] sm:$0xff]   ;;  %v2231_v52 = vld [vmem:[%s3362_s6 + $0x8] sm:$0xff]  }
 0x12a   :  { %2014 = vmatprep.subr.bf16.mxu1 %v2396_v0 }
 0x12d   :  { %2015 = vmatpush3.bf16.msra.mxu1 %v420_v35 }
 0x12e   :  { %v401_v56 = vpop.f32.mrb[16].mxu0  ;;  %2016 = vmatprep.subr.bf16.mxu1 %v2396_v0 }
 0x12f   :  { %v1998_v3 = vpop.f32.mrb[17].mxu0 }
 0x130   :  { %v404_v23 = vpop.f32.mrb[18].mxu0 }
 0x131   :  { %v421_v28 = vpack.c.bf16 %v404_v23, %v401_v56  ;;  %v1999_v29 = vpop.f32.mrb[19].mxu0  ;;  %v2233_v23 = vld [vmem:[%s3362_s6 + $0x20] sm:$0xff]  }
 0x133   :  { %2017 = vmatpush3.bf16.msra.mxu1 %v421_v28 }
 0x134   :  { %2018 = vmatprep.subr.bf16.mxu1 %v2396_v0 }
 0x136   :  { %v409_v30 = vpop.f32.mrb[20].mxu0 }
 0x137   :  { %v422_v43 = vpack.c.bf16 %v409_v30, %v409_v30  ;;  %v2002_v44 = vpop.f32.mrb[21].mxu0  ;;  %v2234_v30 = vld [vmem:[%s3362_s6 + $0x28] sm:$0xff]   ;;  %s1714_s6 = sshll.u32 %s2398_s24, 4  ;;  %s1715_s6 = int_to_ptr.vmem [resolvable:$true] %s1714_s6 }
 0x138   :  { %v412_v45 = vpop.f32.mrb[22].mxu0  ;;  %s2299_s25 = scalar_lea.vmem %s1715_s6, 256  ;;  %p2304_p6 = scmp.lt.s32.totalorder %s1715_s6, %s1715_s6 }
 0x139   :  { %v448_v31 = vsel %vm446_vm3, %v422_v43, 0  ;;  %v2003_v32 = vpop.f32.mrb[23].mxu0  ;;  %p2300_p5 = scmp.ne.s32.totalorder %s1715_s6, %s2299_s25  ;;  %p2305_p7 = scmp.lt.s32.totalorder %s2299_s25, %s2299_s25 }
 0x13a   :  { %2019 = vmatpush3.bf16.msra.mxu1 %v448_v31 }
 0x13b   :  { %2052 = vmatprep.subr.bf16.mxu1 %v2396_v0  ;;  %p2306_p8 = por %p2305_p7, %p2304_p6 }
 0x13d   :  { %2021 = vmatmul.mubr.msk.bf16.vlgmr.msra.gmra.mrb[12].mxu1 %vm436_vm4, %v2829_v40  ;;  %p2307_p9 = pnand %p2306_p8, %p2300_p5 }
 0x13e   :  { %2024 = vmatprep.mubr.msk.bf16.mxu1 %vm2397_vm0, %v2396_v0  ;;  %2053 = vmatpush3.bf16.msra.mxu1 %v2229_v50 }
 0x13f   :  { %2054 = vmatprep.subr.bf16.mxu1 %v2396_v0 }
 0x142   :  { %2055 = vmatpush3.bf16.msra.mxu1 %v2231_v52 }
 0x143   :  { %2084 = vmatprep.subr.bf16.mxu1 %v2396_v0 }
 0x145   :  { %2025 = vmatmul.mubr.msk.bf16.gmra.mrb[16].mxu1 %vm436_vm4, %v2839_v58 }
 0x146   :  { %2028 = vmatprep.mubr.msk.bf16.mxu1 %vm2397_vm0, %v2396_v0 }
 0x14d   :  { %2029 = vmatmul.mubr.msk.bf16.gmra.mrb[20].mxu1 %vm436_vm4, %v2848_v37 }
 0x14e   :  { %2056 = vmatprep.mubr.msk.bf16.mxu1 %vm2397_vm0, %v2396_v0 }
 0x210   :  { %v484_v62 = vpop.f32.mrb[12].mxu1 }
 0x211   :  { %v511_v63 = vmul.f32 0.1, %v484_v62  ;;  %v2022_v10 = vpop.f32.mrb[13].mxu1  ;;  %vm506_vm5 = vcmp.gt.f32.partialorder %v484_v62, 0.0 }
 0x212   :  { %v487_v11 = vpop.f32.mrb[14].mxu1 }
 0x213   :  { %vm507_vm6 = vcmp.gt.f32.partialorder %v487_v11, 0.0  ;;  %v512_v12 = vmul.f32 0.1, %v487_v11  ;;  %v2023_v13 = vpop.f32.mrb[15].mxu1  ;;  %v516_v14 = vsel %vm506_vm5, %v484_v62, %v511_v63 }
 0x215   :  { %v517_v15 = vsel %vm507_vm6, %v487_v11, %v512_v12 }
 0x216   :  { %v521_v1 = vpack.c.bf16 %v517_v15, %v516_v14 }
 0x218   :  { %v492_v2 = vpop.f32.mrb[16].mxu1  ;;  %2041 = vmatmul.mubr.msk.bf16.vlgmr.msra.gmra.mrb[24].mxu0 %vm121_vm1, %v521_v1 }
 0x219   :  { %v513_v17 = vmul.f32 0.1, %v492_v2  ;;  %v2026_v4 = vpop.f32.mrb[17].mxu1  ;;  %2044 = vmatprep.mubr.msk.bf16.mxu0 %vm2397_vm0, %v2396_v0  ;;  %vm508_vm7 = vcmp.gt.f32.partialorder %v492_v2, 0.0  ;;  %2069 = vmatpush3.bf16.msra.mxu0 %v2230_v51 }
 0x21a   :  { %v495_v5 = vpop.f32.mrb[18].mxu1  ;;  %2070 = vmatprep.subr.bf16.mxu0 %v2396_v0 }
 0x21b   :  { %vm509_vm8 = vcmp.gt.f32.partialorder %v495_v5, 0.0  ;;  %v514_v6 = vmul.f32 0.1, %v495_v5  ;;  %v2027_v19 = vpop.f32.mrb[19].mxu1  ;;  %v518_v7 = vsel %vm508_vm7, %v492_v2, %v513_v17 }
 0x21d   :  { %v519_v20 = vsel %vm509_vm8, %v495_v5, %v514_v6  ;;  %2071 = vmatpush3.bf16.msra.mxu0 %v2232_v53 }
 0x21e   :  { %v522_v8 = vpack.c.bf16 %v519_v20, %v518_v7  ;;  %2100 = vmatprep.subr.bf16.mxu0 %v2396_v0 }
 0x220   :  { %2045 = vmatmul.mubr.msk.bf16.gmra.mrb[28].mxu0 %vm121_vm1, %v522_v8  ;;  %v500_v9 = vpop.f32.mrb[20].mxu1 }
 0x221   :  { %vm510_vm9 = vcmp.gt.f32.partialorder %v500_v9, 0.0  ;;  %v515_v21 = vmul.f32 0.1, %v500_v9  ;;  %v2030_v22 = vpop.f32.mrb[21].mxu1  ;;  %2048 = vmatprep.mubr.msk.bf16.mxu0 %vm2397_vm0, %v2396_v0 }
 0x222   :  { %v503_v25 = vpop.f32.mrb[22].mxu1 }
 0x223   :  { %v520_v39 = vsel %vm510_vm9, %v500_v9, %v515_v21  ;;  %v2031_v48 = vpop.f32.mrb[23].mxu1 }
 0x224   :  { %v523_v49 = vpack.c.bf16 %v520_v39, %v520_v39 }
 0x228   :  { %2049 = vmatmul.mubr.msk.bf16.gmra.mrb[32].mxu0 %vm121_vm1, %v523_v49 }
 0x229   :  { %2072 = vmatprep.mubr.msk.bf16.mxu0 %vm2397_vm0, %v2396_v0 }
 0x2eb   :  { %v606_v55 = vpop.f32.mrb[24].mxu0 }
 0x2ec   :  { %v2042_v33 = vpop.f32.mrb[25].mxu0  ;;  %v2890_v34 = vadd.f32 %v1804_v54, %v606_v55 }
 0x2ed   :  { %v609_v35 = vpop.f32.mrb[26].mxu0 }
 0x2ee   :  { %v2892_v36 = vadd.f32 %v1804_v54, %v609_v35  ;;  %v2043_v56 = vpop.f32.mrb[27].mxu0 }
 0x2f0   :  { %v628_v3 = vpack.c.bf16 %v2892_v36, %v2890_v34 }
 0x2f2   :  { %2057 = vmatmul.mubr.msk.bf16.vlgmr.msra.gmra.mrb[24].mxu1 %vm233_vm2, %v628_v3  ;;  %2073 = vmatmul.mubr.msk.bf16.vlgmr.msra.gmra.mrb[36].mxu0 %vm233_vm2, %v628_v3 }
 0x2f3   :  { %v614_v28 = vpop.f32.mrb[28].mxu0  ;;  %2060 = vmatprep.mubr.msk.bf16.mxu1 %vm2397_vm0, %v2396_v0  ;;  %2076 = vmatprep.mubr.msk.bf16.mxu0 %vm2397_vm0, %v2396_v0 }
 0x2f4   :  { %v2046_v29 = vpop.f32.mrb[29].mxu0  ;;  %2085 = vmatpush3.bf16.msra.mxu1 %v2233_v23  ;;  %v2909_v44 = vadd.f32 %v1804_v54, %v614_v28 }
 0x2f5   :  { %v617_v43 = vpop.f32.mrb[30].mxu0  ;;  %2086 = vmatprep.subr.bf16.mxu1 %v2396_v0 }
 0x2f6   :  { %v2911_v45 = vadd.f32 %v1804_v54, %v617_v43  ;;  %v2047_v31 = vpop.f32.mrb[31].mxu0 }
 0x2f8   :  { %v629_v32 = vpack.c.bf16 %v2911_v45, %v2909_v44  ;;  %2087 = vmatpush3.bf16.msra.mxu1 %v2234_v30 }
 0x2f9   :  { %2128 = vmatprep.subr.bf16.mxu1 %v2396_v0 }
 0x2fa   :  { %2061 = vmatmul.mubr.msk.bf16.gmra.mrb[28].mxu1 %vm233_vm2, %v629_v32  ;;  %2077 = vmatmul.mubr.msk.bf16.gmra.mrb[40].mxu0 %vm233_vm2, %v629_v32 }
 0x2fb   :  { %v622_v41 = vpop.f32.mrb[32].mxu0  ;;  %2064 = vmatprep.mubr.msk.bf16.mxu1 %vm2397_vm0, %v2396_v0  ;;  %2080 = vmatprep.mubr.msk.bf16.mxu0 %vm2397_vm0, %v2396_v0 }
 0x2fc   :  { %v2922_v61 = vadd.f32 %v1804_v54, %v622_v41  ;;  %v2050_v62 = vpop.f32.mrb[33].mxu0 }
 0x2fd   :  { %v625_v63 = vpop.f32.mrb[34].mxu0 }
 0x2fe   :  { %v2051_v10 = vpop.f32.mrb[35].mxu0  ;;  %v630_v11 = vpack.c.bf16 %v2922_v61, %v2922_v61 }
 0x302   :  { %2065 = vmatmul.mubr.msk.bf16.gmra.mrb[32].mxu1 %vm233_vm2, %v630_v11  ;;  %2081 = vmatmul.mubr.msk.bf16.gmra.mrb[44].mxu0 %vm233_vm2, %v630_v11 }
 0x303   :  { %2088 = vmatprep.mubr.msk.bf16.mxu1 %vm2397_vm0, %v2396_v0  ;;  %2116 = vmatprep.mubr.msk.bf16.mxu0 %vm2397_vm0, %v2396_v0 }
 0x30a   :  { %2089 = vmatmul.mubr.msk.bf16.vlgmr.msra.gmra.mrb[36].mxu1 %vm233_vm2, %v628_v3 }
 0x30b   :  { %2092 = vmatprep.mubr.msk.bf16.mxu1 %vm2397_vm0, %v2396_v0 }
 0x312   :  { %2093 = vmatmul.mubr.msk.bf16.gmra.mrb[40].mxu1 %vm233_vm2, %v629_v32 }
 0x313   :  { %2096 = vmatprep.mubr.msk.bf16.mxu1 %vm2397_vm0, %v2396_v0 }
 0x31a   :  { %2097 = vmatmul.mubr.msk.bf16.gmra.mrb[44].mxu1 %vm233_vm2, %v630_v11 }
 0x31b   :  { %2132 = vmatprep.mubr.msk.bf16.mxu1 %vm2397_vm0, %v2396_v0 }
 0x3c5   :  { %v690_v12 = vpop.f32.mrb[24].mxu1  ;;  %v763_v13 = vpop.f32.mrb[36].mxu0 }
 0x3c6   :  { %v2058_v14 = vpop.f32.mrb[25].mxu1  ;;  %v2074_v15 = vpop.f32.mrb[37].mxu0 }
 0x3c7   :  { %v693_v1 = vpop.f32.mrb[26].mxu1  ;;  %v766_v2 = vpop.f32.mrb[38].mxu0  ;;  %v2235_v14 = vld [vmem:[%s3363_s7] sm:$0xff]  }
 0x3c8   :  { %v858_v17 = vpack.c.bf16 %v693_v1, %v690_v12  ;;  %v2059_v4 = vpop.f32.mrb[27].mxu1  ;;  %v2075_v5 = vpop.f32.mrb[39].mxu0  ;;  %2129 = vmatpush3.bf16.msra.mxu1 %v2235_v14 }
 0x3c9   :  { %2130 = vmatprep.subr.bf16.mxu1 %v2396_v0 }
 0x3ca   :  { %2101 = vmatpush3.bf16.msra.mxu0 %v858_v17 }
 0x3cb   :  { %2102 = vmatprep.subr.bf16.mxu0 %v2396_v0 }
 0x3cd   :  { %v698_v6 = vpop.f32.mrb[28].mxu1  ;;  %v771_v19 = vpop.f32.mrb[40].mxu0 }
 0x3ce   :  { %v861_v7 = vpack.c.bf16 %v771_v19, %v766_v2  ;;  %v2062_v20 = vpop.f32.mrb[29].mxu1  ;;  %v2078_v8 = vpop.f32.mrb[41].mxu0 }
 0x3cf   :  { %v701_v9 = vpop.f32.mrb[30].mxu1  ;;  %v774_v21 = vpop.f32.mrb[42].mxu0 }
 0x3d0   :  { %v859_v22 = vpack.c.bf16 %v701_v9, %v698_v6  ;;  %v2063_v25 = vpop.f32.mrb[31].mxu1  ;;  %v2079_v39 = vpop.f32.mrb[43].mxu0 }
 0x3d2   :  { %2103 = vmatpush3.bf16.msra.mxu0 %v859_v22 }
 0x3d3   :  { %2104 = vmatprep.subr.bf16.mxu0 %v2396_v0 }
 0x3d5   :  { %v706_v48 = vpop.f32.mrb[32].mxu1  ;;  %v779_v49 = vpop.f32.mrb[44].mxu0 }
 0x3d6   :  { %v860_v50 = vpack.c.bf16 %v763_v13, %v706_v48  ;;  %v862_v51 = vpack.c.bf16 %v779_v49, %v774_v21  ;;  %v2066_v52 = vpop.f32.mrb[33].mxu1  ;;  %v2082_v53 = vpop.f32.mrb[45].mxu0 }
 0x3d7   :  { %v709_v54 = vpop.f32.mrb[34].mxu1  ;;  %v782_v55 = vpop.f32.mrb[46].mxu0 }
 0x3d8   :  { %v2067_v33 = vpop.f32.mrb[35].mxu1  ;;  %v2083_v35 = vpop.f32.mrb[47].mxu0  ;;  %2105 = vmatpush3.bf16.msra.mxu0 %v860_v50  ;;  %v1474_v55 = vmul.f32 %v2703_v26, %v2703_v26 }
 0x3d9   :  { %2106 = vmatprep.subr.bf16.mxu0 %v2396_v0  ;;  %v1518_v33 = vmul.f32 %v2652_v46, %v2652_v46  ;;  %v1475_v35 = vmul.f32 %v2705_v38, %v2705_v38 }
 0x3dc   :  { %2107 = vmatpush3.bf16.msra.mxu0 %v861_v7 }
 0x3dd   :  { %v836_v56 = vpop.f32.mrb[36].mxu1  ;;  %2108 = vmatprep.subr.bf16.mxu0 %v2396_v0 }
 0x3de   :  { %v2090_v3 = vpop.f32.mrb[37].mxu1 }
 0x3df   :  { %v839_v23 = vpop.f32.mrb[38].mxu1  ;;  %v1478_v3 = vsel %vm121_vm1, %v1474_v55, 0.0 }
 0x3e0   :  { %v863_v28 = vpack.c.bf16 %v839_v23, %v836_v56  ;;  %v2091_v29 = vpop.f32.mrb[39].mxu1  ;;  %2109 = vmatpush3.bf16.msra.mxu0 %v862_v51  ;;  %v1519_v56 = vmul.f32 %v2654_v47, %v2654_v47  ;;  %v1522_v23 = vsel %vm121_vm1, %v1518_v33, 0.0  ;;  %1479 = vadd.xlane.f32.xlu0 %v1478_v3 }
 0x3e1   :  { %2110 = vmatprep.subr.bf16.mxu0 %v2396_v0  ;;  %1523 = vadd.xlane.f32.xlu1 %v1522_v23 }
 0x3e2   :  { %v1525_v29 = vsel %vm121_vm1, %v1519_v56, 0.0 }
 0x3e4   :  { %2111 = vmatpush3.bf16.msra.mxu0 %v863_v28  ;;  %v1481_v28 = vsel %vm121_vm1, %v1475_v35, 0.0 }
 0x3e5   :  { %v844_v30 = vpop.f32.mrb[40].mxu1  ;;  %2112 = vmatprep.subr.bf16.mxu0 %v2396_v0  ;;  %1482 = vadd.xlane.f32.xlu0 %v1481_v28 }
 0x3e6   :  { %v2094_v43 = vpop.f32.mrb[41].mxu1  ;;  %1526 = vadd.xlane.f32.xlu1 %v1525_v29 }
 0x3e7   :  { %v847_v31 = vpop.f32.mrb[42].mxu1  ;;  %v1520_v43 = vmul.f32 %v2680_v16, %v2680_v16 }
 0x3e8   :  { %v864_v32 = vpack.c.bf16 %v847_v31, %v844_v30  ;;  %v2095_v41 = vpop.f32.mrb[43].mxu1  ;;  %v1476_v30 = vmul.f32 %v2730_v57, %v2730_v57 }
 0x3e9   :  { %v1617_v41 = vmul.f32 %v2742_v24, %v2742_v24 }
 0x3ea   :  { %2113 = vmatpush3.bf16.msra.mxu0 %v864_v32  ;;  %v1484_v31 = vsel %vm121_vm1, %v1476_v30, 0.0  ;;  %v1528_v32 = vsel %vm121_vm1, %v1520_v43, 0.0  ;;  %v2240_v43 = vld [vmem:[%s3368_s12] sm:$0xff]  }
 0x3eb   :  { %2114 = vmatprep.subr.bf16.mxu0 %v2396_v0  ;;  %1485 = vadd.xlane.f32.xlu0 %v1484_v31  ;;  %v2239_v31 = vld [vmem:[%s3367_s11 + $0x10] ss:$0 sps:$4 sm:$0xff]  }
 0x3ec   :  { %1529 = vadd.xlane.f32.xlu1 %v1528_v32  ;;  %v2241_v32 = vld [vmem:[%s3368_s12 + $0x8] sm:$0xff]  }
 0x3ed   :  { %v852_v62 = vpop.f32.mrb[44].mxu1 }
 0x3ee   :  { %v865_v63 = vpack.c.bf16 %v852_v62, %v852_v62  ;;  %v2098_v10 = vpop.f32.mrb[45].mxu1  ;;  %v1618_v62 = vmul.f32 %v2745_v42, %v2745_v42 }
 0x3ef   :  { %v855_v11 = vpop.f32.mrb[46].mxu1 }
 0x3f0   :  { %v867_v12 = vsel %vm446_vm3, %v865_v63, 0  ;;  %v2099_v13 = vpop.f32.mrb[47].mxu1  ;;  %v1621_v63 = vsel %vm121_vm1, %v1617_v41, 0.0  ;;  %v1624_v10 = vsel %vm121_vm1, %v1618_v62, 0.0  ;;  %v1477_v11 = vmul.f32 %v2737_v27, %v2737_v27  ;;  %v2242_v41 = vld [vmem:[%s3368_s12 + $0x10] ss:$0 sps:$4 sm:$0xff]  }
 0x3f1   :  { %2115 = vmatpush3.bf16.msra.mxu0 %v867_v12  ;;  %v1521_v12 = vmul.f32 %v2683_v18, %v2683_v18  ;;  %1622 = vadd.xlane.f32.xlu0 %v1621_v63  ;;  %v1458_v62 = vmul.f32 %v2703_v26, %v2652_v46 }
 0x3f2   :  { %2144 = vmatprep.subr.bf16.mxu0 %v2396_v0  ;;  %1625 = vadd.xlane.f32.xlu1 %v1624_v10  ;;  %v1487_v13 = vsel %vm121_vm1, %v1477_v11, 0.0  ;;  %v1459_v10 = vmul.f32 %v2705_v38, %v2654_v47 }
 0x3f3   :  { %v1531_v14 = vsel %vm121_vm1, %v1521_v12, 0.0  ;;  %v1462_v63 = vsel %vm121_vm1, %v1458_v62, 0.0  ;;  %v1460_v12 = vmul.f32 %v2730_v57, %v2680_v16 }
 0x3f4   :  { %2117 = vmatmul.mubr.msk.bf16.vlgmr.msra.gmra.mrb[48].mxu0 %vm436_vm4, %v2829_v40  ;;  %v2236_v40 = vld [vmem:[%s3363_s7 + $0x8] sm:$0xff]   ;;  %v1465_v11 = vsel %vm121_vm1, %v1459_v10, 0.0 }
 0x3f5   :  { %2120 = vmatprep.mubr.msk.bf16.mxu0 %vm2397_vm0, %v2396_v0  ;;  %2131 = vmatpush3.bf16.msra.mxu1 %v2236_v40  ;;  %v1619_v40 = vmul.f32 %v2769_v59, %v2769_v59 }
 0x3f6   :  { %2158 = vmatprep.subr.bf16.mxu1 %v2396_v0  ;;  %1488 = vadd.xlane.f32.xlu0 %v1487_v13  ;;  %v1468_v13 = vsel %vm121_vm1, %v1460_v12, 0.0 }
 0x3f7   :  { %1532 = vadd.xlane.f32.xlu1 %v1531_v14  ;;  %v1601_v14 = vmul.f32 %v2742_v24, %v2703_v26  ;;  %v1604_v24 = vmul.f32 %v2771_v60, %v2737_v27 }
 0x3f9   :  { %v1605_v46 = vsel %vm121_vm1, %v1601_v14, 0.0 }
 0x3fc   :  { %2121 = vmatmul.mubr.msk.bf16.gmra.mrb[52].mxu0 %vm436_vm4, %v2839_v58 }
 0x3fd   :  { %2124 = vmatprep.mubr.msk.bf16.mxu0 %vm2397_vm0, %v2396_v0 }
 0x404   :  { %2125 = vmatmul.mubr.msk.bf16.gmra.mrb[56].mxu0 %vm436_vm4, %v2848_v37  ;;  %vm1151_vm4 = vcmask 195584  }
 0x405   :  { %2146 = vmatprep.mubr.msk.bf16.mxu0 %vm2397_vm0, %v2396_v0 }
 0x4c7   :  { %v903_v58 = vpop.f32.mrb[48].mxu0 }
 0x4c8   :  { %v930_v15 = vmul.f32 0.1, %v903_v58  ;;  %v2118_v37 = vpop.f32.mrb[49].mxu0  ;;  %vm925_vm10 = vcmp.gt.f32.partialorder %v903_v58, 0.0 }
 0x4c9   :  { %v906_v1 = vpop.f32.mrb[50].mxu0 }
 0x4ca   :  { %vm926_vm11 = vcmp.gt.f32.partialorder %v906_v1, 0.0  ;;  %v931_v2 = vmul.f32 0.1, %v906_v1  ;;  %v2119_v17 = vpop.f32.mrb[51].mxu0  ;;  %v935_v4 = vsel %vm925_vm10, %v903_v58, %v930_v15  ;;  %v1620_v58 = vmul.f32 %v2771_v60, %v2771_v60 }
 0x4cb   :  { %v1627_v15 = vsel %vm121_vm1, %v1619_v40, 0.0  ;;  %v1602_v40 = vmul.f32 %v2745_v42, %v2705_v38  ;;  %v1614_v38 = vsel %vm121_vm1, %v1604_v24, 0.0  ;;  %v2246_v42 = vld [vmem:[%s3365_s9 + $0x18] sm:$0xff]  }
 0x4cc   :  { %v936_v5 = vsel %vm926_vm11, %v906_v1, %v931_v2  ;;  %v1630_v37 = vsel %vm121_vm1, %v1620_v58, 0.0  ;;  %1628 = vadd.xlane.f32.xlu0 %v1627_v15  ;;  %v1838_v1 = vld [vmem:[%s3364_s8] ss:$0 sm:$0xff]  ;;  %v1461_v58 = vmul.f32 %v2737_v27, %v2683_v18  ;;  %v1603_v15 = vmul.f32 %v2769_v59, %v2730_v57  ;;  %v2245_v18 = vld [vmem:[%s3365_s9 + $0x8] sm:$0xff]   ;;  %v1480_v57 = vpop.xlane.xlu0 %1479  ;;  %v3103_v59 = vpop.xlane.xlu1 %1523 }
 0x4cd   :  { %v940_v6 = vpack.c.bf16 %v936_v5, %v935_v4  ;;  %1631 = vadd.xlane.f32.xlu1 %v1630_v37  ;;  %v1608_v47 = vsel %vm121_vm1, %v1602_v40, 0.0  ;;  %2247 = vrsqrt.f32 %v1480_v57  ;;  %vm1536_vm5 = vcmp.eq.f32.partialorder %v3103_v59, inf }
 0x4ce   :  { %v1471_v16 = vsel %vm121_vm1, %v1461_v58, 0.0  ;;  %v1611_v26 = vsel %vm121_vm1, %v1603_v15, 0.0  ;;  %2249 = vrsqrt.f32 %v3103_v59  ;;  %vm1492_vm1 = vcmp.eq.f32.partialorder %v1480_v57, inf }
 0x4cf   :  { %v911_v19 = vpop.f32.mrb[52].mxu0  ;;  %2133 = vmatmul.mubr.msk.bf16.vlgmr.msra.gmra.mrb[48].mxu1 %vm233_vm2, %v940_v6  ;;  %vm1538_vm6 = vcmp.eq.f32.partialorder %v3103_v59, 0.0 }
 0x4d0   :  { %vm927_vm12 = vcmp.gt.f32.partialorder %v911_v19, 0.0  ;;  %v932_v7 = vmul.f32 0.1, %v911_v19  ;;  %v2122_v20 = vpop.f32.mrb[53].mxu0  ;;  %2136 = vmatprep.mubr.msk.bf16.mxu1 %vm2397_vm0, %v2396_v0  ;;  %1463 = vadd.xlane.f32.xlu0 %v1462_v63  ;;  %v3105_v37 = vpop.xlane.xlu0 %1482 }
 0x4d1   :  { %v914_v8 = vpop.f32.mrb[54].mxu0  ;;  %1466 = vadd.xlane.f32.xlu1 %v1465_v11  ;;  %v3107_v27 = vpop.xlane.xlu1 %1526  ;;  %2251 = vrsqrt.f32 %v3105_v37  ;;  %vm1499_vm7 = vcmp.eq.f32.partialorder %v3105_v37, inf  ;;  %vm1501_vm8 = vcmp.eq.f32.partialorder %v3105_v37, 0.0 }
 0x4d2   :  { %v937_v9 = vsel %vm927_vm12, %v911_v19, %v932_v7  ;;  %vm928_vm13 = vcmp.gt.f32.partialorder %v914_v8, 0.0  ;;  %v933_v21 = vmul.f32 0.1, %v914_v8  ;;  %v2123_v22 = vpop.f32.mrb[55].mxu0  ;;  %2253 = vrsqrt.f32 %v3107_v27 }
 0x4d3   :  { %vm1543_vm9 = vcmp.eq.f32.partialorder %v3107_v27, inf  ;;  %vm1545_vm10 = vcmp.eq.f32.partialorder %v3107_v27, 0.0 }
 0x4d4   :  { %v938_v25 = vsel %vm928_vm13, %v914_v8, %v933_v21  ;;  %1469 = vadd.xlane.f32.xlu0 %v1468_v13  ;;  %v3109_v60 = vpop.xlane.xlu0 %1485 }
 0x4d5   :  { %v941_v39 = vpack.c.bf16 %v938_v25, %v937_v9  ;;  %1606 = vadd.xlane.f32.xlu1 %v1605_v46  ;;  %2255 = vrsqrt.f32 %v3109_v60  ;;  %vm1506_vm11 = vcmp.eq.f32.partialorder %v3109_v60, inf  ;;  %vm1508_vm12 = vcmp.eq.f32.partialorder %v3109_v60, 0.0 }
 0x4d7   :  { %2137 = vmatmul.mubr.msk.bf16.gmra.mrb[52].mxu1 %vm233_vm2, %v941_v39  ;;  %v919_v48 = vpop.f32.mrb[56].mxu0 }
 0x4d8   :  { %vm929_vm14 = vcmp.gt.f32.partialorder %v919_v48, 0.0  ;;  %v934_v49 = vmul.f32 0.1, %v919_v48  ;;  %2140 = vmatprep.mubr.msk.bf16.mxu1 %vm2397_vm0, %v2396_v0  ;;  %v2126_v50 = vpop.f32.mrb[57].mxu0  ;;  %1609 = vadd.xlane.f32.xlu0 %v1608_v47 }
 0x4d9   :  { %v922_v51 = vpop.f32.mrb[58].mxu0  ;;  %1472 = vadd.xlane.f32.xlu1 %v1471_v16 }
 0x4da   :  { %v939_v52 = vsel %vm929_vm14, %v919_v48, %v934_v49  ;;  %v2127_v53 = vpop.f32.mrb[59].mxu0  ;;  %v2237_v49 = vld [vmem:[%s3367_s11] sm:$0xff]  }
 0x4db   :  { %v942_v54 = vpack.c.bf16 %v939_v52, %v939_v52 }
 0x4dc   :  { %1612 = vadd.xlane.f32.xlu0 %v1611_v26 }
 0x4dd   :  { %1615 = vadd.xlane.f32.xlu1 %v1614_v38 }
 0x4df   :  { %2141 = vmatmul.mubr.msk.bf16.gmra.mrb[56].mxu1 %vm233_vm2, %v942_v54 }
 0x4e0   :  { %2162 = vmatprep.mubr.msk.bf16.mxu1 %vm2397_vm0, %v2396_v0 }
 0x5a2   :  { %v1009_v2 = vpop.f32.mrb[48].mxu1 }
 0x5a3   :  { %v1010_v17 = vadd.f32 %v1838_v1, %v1009_v2  ;;  %v2134_v4 = vpop.f32.mrb[49].mxu1  ;;  %v3113_v2 = vpop.xlane.xlu0 %1622 }
 0x5a4   :  { %v1012_v5 = vpop.f32.mrb[50].mxu1 }
 0x5a5   :  { %v1031_v6 = vmul.f32 0.5, %v1010_v17  ;;  %v1013_v19 = vadd.f32 %v1838_v1, %v1012_v5  ;;  %v2135_v7 = vpop.f32.mrb[51].mxu1 }
 0x5a7   :  { %v1036_v20 = vadd.f32 %v1031_v6, %v2890_v34  ;;  %v1032_v8 = vmul.f32 0.5, %v1013_v19  ;;  %v3121_v4 = vpop.xlane.xlu0 %1488  ;;  %v2248_v6 = vpop.eup %2247 }
 0x5a8   :  { %v2250_v19 = vpop.eup %2249  ;;  %v1516_v13 = vand.u32 2147483648, %v3121_v4 }
 0x5a9   :  { %1041 = vst.msk [vmem:[#allocation6] sm:$0xff] %vm233_vm2, %v1036_v20  ;;  %v1037_v9 = vadd.f32 %v1032_v8, %v2892_v36  ;;  %v2243_v36 = vld [vmem:[%s3365_s9] sm:$0xff]   ;;  %v2252_v8 = vpop.eup %2251 }
 0x5aa   :  { %v1017_v21 = vpop.f32.mrb[52].mxu1 }
 0x5ab   :  { %1042 = vst.msk [vmem:[#allocation6 + $0x8] sm:$0xff] %vm233_vm2, %v1037_v9  ;;  %v1051_v22 = vpack.c.bf16 %v1037_v9, %v1036_v20  ;;  %v1018_v25 = vadd.f32 %v1838_v1, %v1017_v21  ;;  %v2138_v39 = vpop.f32.mrb[53].mxu1  ;;  %v3129_v7 = vpop.xlane.xlu0 %1628  ;;  %v1491_v20 = vmul.f32 %v2248_v6, %v1480_v57  ;;  %v1495_v9 = vand.u32 2147483648, %v1480_v57 }
 0x5ac   :  { %v1020_v48 = vpop.f32.mrb[54].mxu1  ;;  %v1539_v39 = vand.u32 2147483648, %v3103_v59 }
 0x5ad   :  { %v1033_v50 = vmul.f32 0.5, %v1018_v25  ;;  %v1021_v51 = vadd.f32 %v1838_v1, %v1020_v48  ;;  %2145 = vmatpush3.bf16.msra.mxu0 %v1051_v22  ;;  %v2139_v34 = vpop.f32.mrb[55].mxu1  ;;  %v2254_v22 = vpop.eup %2253  ;;  %v1535_v25 = vmul.f32 %v2250_v19, %v3103_v59 }
 0x5ae   :  { %2174 = vmatprep.subr.bf16.mxu0 %v2396_v0  ;;  %v2256_v48 = vpop.eup %2255  ;;  %v1546_v34 = vand.u32 2147483648, %v3107_v27 }
 0x5af   :  { %v1038_v52 = vadd.f32 %v1033_v50, %v2909_v44  ;;  %v1034_v53 = vmul.f32 0.5, %v1021_v51  ;;  %v2238_v44 = vld [vmem:[%s3367_s11 + $0x8] sm:$0xff]   ;;  %v1493_v51 = vsel %vm1492_vm1, %v1480_v57, %v1491_v20  ;;  %v1652_v20 = vand.u32 2147483648, %v3129_v7 }
 0x5b0   :  { %2147 = vmatmul.mubr.msk.bf16.vlgmr.msra.gmra.mrb[60].mxu0 %vm1065_vm15, %v2237_v49  ;;  %v1502_v49 = vand.u32 2147483648, %v3105_v37 }
 0x5b1   :  { %1043 = vst.msk [vmem:[#allocation8] sm:$0xff] %vm233_vm2, %v1038_v52  ;;  %v1039_v54 = vadd.f32 %v1034_v53, %v2911_v45  ;;  %2150 = vmatprep.mubr.msk.bf16.mxu0 %vm2397_vm0, %v2396_v0  ;;  %2175 = vmatpush3.bf16.msra.mxu0 %v2243_v36  ;;  %v1498_v36 = vmul.f32 %v2252_v8, %v3105_v37 }
 0x5b2   :  { %v1025_v55 = vpop.f32.mrb[56].mxu1  ;;  %2176 = vmatprep.subr.bf16.mxu0 %v2396_v0 }
 0x5b3   :  { %1044 = vst.msk [vmem:[#allocation8 + $0x8] sm:$0xff] %vm233_vm2, %v1039_v54  ;;  %v1136_v33 = vpack.c.bf16 %v1039_v54, %v1038_v52  ;;  %v1026_v35 = vadd.f32 %v1838_v1, %v1025_v55  ;;  %v2142_v56 = vpop.f32.mrb[57].mxu1  ;;  %v3111_v1 = vpop.xlane.xlu1 %1529  ;;  %v1542_v52 = vmul.f32 %v2254_v22, %v3107_v27  ;;  %v1537_v54 = vsel %vm1536_vm5, %v3103_v59, %v1535_v25 }
 0x5b4   :  { %v1028_v3 = vpop.f32.mrb[58].mxu1  ;;  %2257 = vrsqrt.f32 %v3111_v1  ;;  %v1505_v55 = vmul.f32 %v2256_v48, %v3109_v60  ;;  %vm1550_vm13 = vcmp.eq.f32.partialorder %v3111_v1, inf  ;;  %vm1552_vm14 = vcmp.eq.f32.partialorder %v3111_v1, 0.0 }
 0x5b5   :  { %v1035_v23 = vmul.f32 0.5, %v1026_v35  ;;  %2159 = vmatpush3.bf16.msra.mxu1 %v1136_v33  ;;  %v2143_v45 = vpop.f32.mrb[59].mxu1  ;;  %2177 = vmatpush3.bf16.msra.mxu0 %v2245_v18  ;;  %2259 = vrsqrt.f32 %v3113_v2  ;;  %v1509_v33 = vand.u32 2147483648, %v3109_v60  ;;  %vm1513_vm5 = vcmp.eq.f32.partialorder %v3121_v4, inf }
 0x5b6   :  { %2160 = vmatprep.subr.bf16.mxu1 %v2396_v0 }
 0x5b7   :  { %v1040_v28 = vadd.f32 %v1035_v23, %v2922_v61  ;;  %v2244_v61 = vld [vmem:[%s3365_s9 + $0x10] sm:$0xff]   ;;  %v3116_v17 = vpop.xlane.xlu1 %1625  ;;  %v1638_v23 = vand.u32 2147483648, %v3113_v2 }
 0x5b8   :  { %2151 = vmatmul.mubr.msk.bf16.gmra.mrb[64].mxu0 %vm1065_vm15, %v2238_v44  ;;  %2261 = vrsqrt.f32 %v3116_v17  ;;  %v1553_v44 = vand.u32 2147483648, %v3111_v1  ;;  %vm1642_vm1 = vcmp.eq.f32.partialorder %v3116_v17, inf }
 0x5b9   :  { %1045 = vst.msk [vmem:[#allocation8 + $0x10] sm:$0xff] %vm233_vm2, %v1040_v28  ;;  %v1137_v29 = vpack.c.bf16 %v1040_v28, %v1040_v28  ;;  %2154 = vmatprep.mubr.msk.bf16.mxu0 %vm2397_vm0, %v2396_v0  ;;  %2263 = vrsqrt.f32 %v3121_v4  ;;  %v1540_v28 = vsel %vm1538_vm6, %v1539_v39, %v1537_v54  ;;  %vm1515_vm6 = vcmp.eq.f32.partialorder %v3121_v4, 0.0 }
 0x5ba   :  { %v1566_v14 = vmax.f32 %v1540_v28, 1e-08 }
 0x5bb   :  { %v1162_v30 = vsel %vm446_vm3, %v1137_v29, 0  ;;  %v3124_v5 = vpop.xlane.xlu1 %1532  ;;  %vm1494_vm3 = vcmp.eq.f32.partialorder %v1480_v57, 0.0  ;;  %v1500_v29 = vsel %vm1499_vm7, %v3105_v37, %v1498_v36 }
 0x5bc   :  { %2161 = vmatpush3.bf16.msra.mxu1 %v1162_v30  ;;  %2265 = vrsqrt.f32 %v3124_v5  ;;  %v3158_v35 = vsel %vm1494_vm3, %v1495_v9, %v1493_v51  ;;  %v1544_v30 = vsel %vm1543_vm9, %v3107_v27, %v1542_v52  ;;  %vm1644_vm3 = vcmp.eq.f32.partialorder %v3116_v17, 0.0 }
 0x5bd   :  { %2190 = vmatprep.subr.bf16.mxu1 %v2396_v0  ;;  %2267 = vrsqrt.f32 %v3129_v7  ;;  %v1503_v11 = vsel %vm1501_vm8, %v1502_v49, %v1500_v29  ;;  %v1547_v12 = vsel %vm1545_vm10, %v1546_v34, %v1544_v30  ;;  %vm1557_vm7 = vcmp.eq.f32.partialorder %v3124_v5, inf }
 0x5be   :  { %v2258_v50 = vpop.eup %2257  ;;  %vm1559_vm8 = vcmp.eq.f32.partialorder %v3124_v5, 0.0  ;;  %v1560_v26 = vand.u32 2147483648, %v3124_v5  ;;  %v1563_v18 = vmax.f32 %v1503_v11, 1e-08  ;;  %vm1649_vm9 = vcmp.eq.f32.partialorder %v3129_v7, inf }
 0x5bf   :  { %2163 = vmatmul.mubr.msk.bf16.vlgmr.msra.gmra.mrb[60].mxu1 %vm1151_vm4, %v2240_v43  ;;  %v3133_v21 = vpop.xlane.xlu1 %1631  ;;  %v2260_v53 = vpop.eup %2259  ;;  %v1549_v56 = vmul.f32 %v2258_v50, %v3111_v1 }
 0x5c0   :  { %2155 = vmatmul.mubr.msk.bf16.gmra.mrb[68].mxu0 %vm1065_vm15, %v2239_v31  ;;  %2166 = vmatprep.mubr.msk.bf16.mxu1 %vm2397_vm0, %v2396_v0  ;;  %2269 = vrsqrt.f32 %v3133_v21  ;;  %vm1635_vm15 = vcmp.eq.f32.partialorder %v3113_v2, inf  ;;  %v1634_v43 = vmul.f32 %v2260_v53, %v3113_v2  ;;  %vm1656_vm10 = vcmp.eq.f32.partialorder %v3133_v21, inf }
 0x5c1   :  { %2191 = vmatpush3.bf16.msra.mxu1 %v2244_v61  ;;  %2178 = vmatprep.mubr.msk.bf16.mxu0 %vm2397_vm0, %v2396_v0  ;;  %v1507_v61 = vsel %vm1506_vm11, %v3109_v60, %v1505_v55  ;;  %v1551_v62 = vsel %vm1550_vm13, %v3111_v1, %v1549_v56  ;;  %vm1651_vm11 = vcmp.eq.f32.partialorder %v3129_v7, 0.0  ;;  %vm1582_vm13 = vcmask 7168  }
 0x5c2   :  { %2192 = vmatprep.subr.bf16.mxu1 %v2396_v0  ;;  %v2262_v3 = vpop.eup %2261  ;;  %v1510_v46 = vsel %vm1508_vm12, %v1509_v33, %v1507_v61  ;;  %v1636_v40 = vsel %vm1635_vm15, %v3113_v2, %v1634_v43  ;;  %v1554_v15 = vsel %vm1552_vm14, %v1553_v44, %v1551_v62  ;;  %vm1658_vm12 = vcmp.eq.f32.partialorder %v3133_v21, 0.0 }
 0x5c3   :  { %v2264_v45 = vpop.eup %2263  ;;  %v1641_v63 = vmul.f32 %v2262_v3, %v3116_v17  ;;  %v1564_v37 = vmax.f32 %v1510_v46, 1e-08  ;;  %v1568_v6 = vmax.f32 %v1554_v15, 1e-08  ;;  %v1467_v3 = vpop.xlane.xlu1 %1466 }
 0x5c4   :  { %v1512_v47 = vmul.f32 %v2264_v45, %v3121_v4 }
 0x5c5   :  { %2193 = vmatpush3.bf16.msra.mxu1 %v2246_v42  ;;  %v1643_v24 = vsel %vm1642_vm1, %v3116_v17, %v1641_v63  ;;  %v1567_v42 = vmax.f32 %v1547_v12, 1e-08  ;;  %v1572_v48 = vmul.f32 %v1568_v6, %v1564_v37 }
 0x5c6   :  { %v2266_v31 = vpop.eup %2265  ;;  %v1514_v27 = vsel %vm1513_vm5, %v3121_v4, %v1512_v47 }
 0x5c7   :  { %2167 = vmatmul.mubr.msk.bf16.gmra.mrb[64].mxu1 %vm1151_vm4, %v2241_v32  ;;  %v1645_v32 = vand.u32 2147483648, %v3116_v17  ;;  %v2268_v10 = vpop.eup %2267  ;;  %v1556_v58 = vmul.f32 %v2266_v31, %v3124_v5  ;;  %v1571_v8 = vmul.f32 %v1567_v42, %v1563_v18  ;;  %v1517_v22 = vsel %vm1515_vm6, %v1516_v13, %v1514_v27  ;;  %v1607_v63 = vpop.xlane.xlu1 %1606 }
 0x5c8   :  { %2170 = vmatprep.mubr.msk.bf16.mxu1 %vm2397_vm0, %v2396_v0  ;;  %v1648_v38 = vmul.f32 %v2268_v10, %v3129_v7  ;;  %v1659_v17 = vand.u32 2147483648, %v3133_v21  ;;  %v1565_v51 = vmax.f32 %v1517_v22, 1e-08 }
 0x5c9   :  { %v1558_v60 = vsel %vm1557_vm7, %v3124_v5, %v1556_v58  ;;  %v1646_v19 = vsel %vm1644_vm3, %v1645_v32, %v1643_v24 }
 0x5ca   :  { %v2270_v16 = vpop.eup %2269  ;;  %v1561_v25 = vsel %vm1559_vm8, %v1560_v26, %v1558_v60  ;;  %v1662_v49 = vmax.f32 %v1646_v19, 1e-08 }
 0x5cb   :  { %v1655_v1 = vmul.f32 %v2270_v16, %v3133_v21  ;;  %v1569_v34 = vmax.f32 %v1561_v25, 1e-08  ;;  %v1473_v16 = vpop.xlane.xlu1 %1472 }
 0x5cc   :  { %v1666_v4 = vmul.f32 %v1662_v49, %v1563_v18 }
 0x5cd   :  { %v1657_v39 = vsel %vm1656_vm10, %v3133_v21, %v1655_v1  ;;  %v1573_v5 = vmul.f32 %v1569_v34, %v1565_v51 }
 0x5ce   :  { %v1660_v36 = vsel %vm1658_vm12, %v1659_v17, %v1657_v39 }
 0x5cf   :  { %2171 = vmatmul.mubr.msk.bf16.gmra.mrb[68].mxu1 %vm1151_vm4, %v2242_v41  ;;  %vm1637_vm4 = vcmp.eq.f32.partialorder %v3113_v2, 0.0  ;;  %v1562_v41 = vmax.f32 %v3158_v35, 1e-08  ;;  %v1650_v2 = vsel %vm1649_vm9, %v3129_v7, %v1648_v38  ;;  %v1664_v53 = vmax.f32 %v1660_v36, 1e-08  ;;  %v1464_v35 = vpop.xlane.xlu0 %1463  ;;  %v1616_v1 = vpop.xlane.xlu1 %1615 }
 0x5d0   :  { %2194 = vmatprep.mubr.msk.bf16.mxu1 %vm2397_vm0, %v2396_v0  ;;  %v1639_v57 = vsel %vm1637_vm4, %v1638_v23, %v1636_v40  ;;  %v1653_v50 = vsel %vm1651_vm11, %v1652_v20, %v1650_v2 }
 0x5d1   :  { %v1570_v59 = vmul.f32 %v1566_v14, %v1562_v41  ;;  %v1661_v9 = vmax.f32 %v1639_v57, 1e-08  ;;  %v1663_v52 = vmax.f32 %v1653_v50, 1e-08  ;;  %v1668_v21 = vmul.f32 %v1664_v53, %v1565_v51 }
 0x5d3   :  { %2271 = vrcp.f32 %v1570_v59  ;;  %v1665_v7 = vmul.f32 %v1661_v9, %v1562_v41  ;;  %v1667_v54 = vmul.f32 %v1663_v52, %v1564_v37  ;;  %v1470_v30 = vpop.xlane.xlu0 %1469 }
 0x5d4   :  { %2273 = vrcp.f32 %v1571_v8 }
 0x5d5   :  { %2275 = vrcp.f32 %v1572_v48 }
 0x5d6   :  { %2277 = vrcp.f32 %v1665_v7 }
 0x5d7   :  { %2279 = vrcp.f32 %v1666_v4  ;;  %v1610_v46 = vpop.xlane.xlu0 %1609 }
 0x5d8   :  { %2281 = vrcp.f32 %v1573_v5 }
 0x5d9   :  { %2283 = vrcp.f32 %v1667_v54 }
 0x5da   :  { %2285 = vrcp.f32 %v1668_v21 }
 0x5db   :  { %v1613_v57 = vpop.xlane.xlu0 %1612 }
 0x5dd   :  { %v2272_v55 = vpop.eup %2271 }
 0x5de   :  { %v2274_v33 = vpop.eup %2273  ;;  %v1575_v56 = vmul.f32 %v2272_v55, %v1464_v35 }
 0x5df   :  { %v2276_v44 = vpop.eup %2275  ;;  %v1577_v45 = vmul.f32 %v2274_v33, %v1467_v3 }
 0x5e0   :  { %v1583_v23 = vsel %vm1582_vm13, %v1575_v56, 0.0  ;;  %v2278_v28 = vpop.eup %2277  ;;  %v1579_v61 = vmul.f32 %v2276_v44, %v1470_v30 }
 0x5e1   :  { %v1584_v31 = vsel %vm1582_vm13, %v1577_v45, 0.0  ;;  %v2280_v32 = vpop.eup %2279  ;;  %v1670_v13 = vmul.f32 %v2278_v28, %v1607_v63 }
 0x5e2   :  { %v1585_v62 = vadd.f32 %v1584_v31, %v1583_v23  ;;  %v1586_v12 = vsel %vm1582_vm13, %v1579_v61, 0.0  ;;  %v2282_v14 = vpop.eup %2281  ;;  %v1672_v47 = vmul.f32 %v2280_v32, %v1610_v46 }
 0x5e3   :  { %v1677_v40 = vsel %vm1582_vm13, %v1670_v13, 0.0  ;;  %v2284_v58 = vpop.eup %2283  ;;  %v1581_v24 = vmul.f32 %v2282_v14, %v1473_v16 }
 0x5e4   :  { %v1587_v15 = vadd.f32 %v1586_v12, %v1585_v62  ;;  %v1678_v26 = vsel %vm1582_vm13, %v1672_v47, 0.0  ;;  %v2286_v38 = vpop.eup %2285  ;;  %v1674_v37 = vmul.f32 %v2284_v58, %v1613_v57 }
 0x5e5   :  { %v1679_v42 = vadd.f32 %v1678_v26, %v1677_v40  ;;  %v1588_v27 = vsel %vm1582_vm13, %v1581_v24, 0.0  ;;  %v1676_v8 = vmul.f32 %v2286_v38, %v1616_v1 }
 0x5e6   :  { %v1589_v6 = vadd.f32 %v1588_v27, %v1587_v15  ;;  %v1680_v2 = vsel %vm1582_vm13, %v1674_v37, 0.0 }
 0x5e7   :  { %v1681_v9 = vadd.f32 %v1680_v2, %v1679_v42  ;;  %v1682_v22 = vsel %vm1582_vm13, %v1676_v8, 0.0 }
 0x5e8   :  { %1590 = vadd.xlane.f32.xlu0 %v1589_v6 }
 0x5e9   :  { %v1683_v25 = vadd.f32 %v1682_v22, %v1681_v9 }
 0x5eb   :  { %1684 = vadd.xlane.f32.xlu1 %v1683_v25 }
 0x675   :  { %v1591_v33 = vpop.xlane.xlu0 %1590 }
 0x676   :  { %v1592_v35 = vrot.slane %v1591_v33, 4 }
 0x678   :  { %v1593_v56 = vadd.f32 %v1592_v35, %v1591_v33  ;;  %v1685_v44 = vpop.xlane.xlu1 %1684 }
 0x679   :  { %v1686_v23 = vrot.slane %v1685_v44, 4 }
 0x67a   :  { %v1594_v3 = vrot.slane %v1593_v56, 2 }
 0x67b   :  { %v1687_v45 = vadd.f32 %v1686_v23, %v1685_v44 }
 0x67c   :  { %v1595_v28 = vadd.f32 %v1594_v3, %v1593_v56 }
 0x67e   :  { %v1596_v30 = vrot.slane %v1595_v28, 1 }
 0x683   :  { %v1109_v29 = vpop.f32.mrb[60].mxu0 }
 0x684   :  { %v2148_v43 = vpop.f32.mrb[61].mxu0 }
 0x685   :  { %v1112_v41 = vpop.f32.mrb[62].mxu0  ;;  %v1597_v43 = vadd.f32 %v1596_v30, %v1595_v28 }
 0x686   :  { %v1220_v10 = vpack.c.bf16 %v1112_v41, %v1109_v29  ;;  %v2149_v11 = vpop.f32.mrb[63].mxu0  ;;  %v1688_v29 = vrot.slane %v1687_v45, 2 }
 0x687   :  { %2206 = vpush %v1597_v43 }
 0x688   :  { %2179 = vmatmul.mubr.msk.bf16.vlgmr.msra.gmra.mrb[72].mxu0 %vm233_vm2, %v1220_v10  ;;  %2195 = vmatmul.mubr.msk.bf16.vlgmr.msra.gmra.mrb[72].mxu1 %vm233_vm2, %v1220_v10  ;;  %v1689_v31 = vadd.f32 %v1688_v29, %v1687_v45 }
 0x689   :  { %2182 = vmatprep.mubr.msk.bf16.mxu0 %vm2397_vm0, %v2396_v0  ;;  %2198 = vmatprep.mubr.msk.bf16.mxu1 %vm2397_vm0, %v2396_v0 }
 0x68a   :  { %v1690_v61 = vrot.slane %v1689_v31, 1 }
 0x68b   :  { %v1117_v18 = vpop.f32.mrb[64].mxu0 }
 0x68c   :  { %v2152_v59 = vpop.f32.mrb[65].mxu0  ;;  %v1691_v32 = vadd.f32 %v1690_v61, %v1689_v31 }
 0x68d   :  { %v1120_v60 = vpop.f32.mrb[66].mxu0 }
 0x68e   :  { %v1221_v19 = vpack.c.bf16 %v1120_v60, %v1117_v18  ;;  %v2153_v20 = vpop.f32.mrb[67].mxu0  ;;  %2208 = vpush %v1691_v32 }
 0x690   :  { %2183 = vmatmul.mubr.msk.bf16.gmra.mrb[76].mxu0 %vm233_vm2, %v1221_v19  ;;  %2199 = vmatmul.mubr.msk.bf16.gmra.mrb[76].mxu1 %vm233_vm2, %v1221_v19 }
 0x691   :  { %2186 = vmatprep.mubr.msk.bf16.mxu0 %vm2397_vm0, %v2396_v0  ;;  %2202 = vmatprep.mubr.msk.bf16.mxu1 %vm2397_vm0, %v2396_v0  ;;  %vm1695_vm0 = vcmask 0  }
 0x692   :  { %v1198_v17 = vpop.f32.mrb[60].mxu1 }
 0x693   :  { %v1125_v39 = vpop.f32.mrb[68].mxu0  ;;  %v2164_v48 = vpop.f32.mrb[61].mxu1 }
 0x694   :  { %v1222_v49 = vpack.c.bf16 %v1125_v39, %v1125_v39  ;;  %v2156_v50 = vpop.f32.mrb[69].mxu0  ;;  %v1201_v7 = vpop.f32.mrb[62].mxu1 }
 0x695   :  { %v1128_v51 = vpop.f32.mrb[70].mxu0  ;;  %v2165_v34 = vpop.f32.mrb[63].mxu1 }
 0x696   :  { %v2157_v36 = vpop.f32.mrb[71].mxu0 }
 0x698   :  { %2187 = vmatmul.mubr.msk.bf16.gmra.mrb[80].mxu0 %vm233_vm2, %v1222_v49  ;;  %2203 = vmatmul.mubr.msk.bf16.gmra.mrb[80].mxu1 %vm233_vm2, %v1222_v49 }
 0x69a   :  { %v1206_v4 = vpop.f32.mrb[64].mxu1 }
 0x69b   :  { %v2168_v52 = vpop.f32.mrb[65].mxu1 }
 0x69c   :  { %v1209_v5 = vpop.f32.mrb[66].mxu1 }
 0x69d   :  { %v2169_v53 = vpop.f32.mrb[67].mxu1 }
 0x6a2   :  { %v3252_v0 = vpop.f32.mrb[68].mxu1 }
 0x6a3   :  { %v2172_v54 = vpop.f32.mrb[69].mxu1 }
 0x6a4   :  { %v1217_v55 = vpop.f32.mrb[70].mxu1 }
 0x6a5   :  { %v2173_v21 = vpop.f32.mrb[71].mxu1 }
 0x6b8   :  { %s2207_s9 = spop %2206 }
 0x6b9   :  { %v1599_v46 = vstv %s2207_s9 }
 0x6ba   :  { %v1600_v24 = vsub.f32 0.0, %v1599_v46 }
 0x6bf   :  { %s2209_s5 = spop %2208 }
 0x6c0   :  { %v1693_v38 = vstv %s2209_s5 }
 0x6c1   :  { %v1694_v18 = vsub.f32 %v1600_v24, %v1693_v38 }
 0x6c3   :  { %1696 = vst.msk [vmem:[#allocation5] sm:$0x1] %vm1695_vm0, %v1694_v18 }
 0x75b   :  { %v1282_v41 = vpop.f32.mrb[72].mxu0  ;;  %v1392_v62 = vpop.f32.mrb[72].mxu1 }
 0x75c   :  { %v1304_v63 = vmul.f32 %v1282_v41, %v1198_v17  ;;  %v1414_v10 = vmul.f32 %v1392_v62, %v1198_v17  ;;  %v2180_v11 = vpop.f32.mrb[73].mxu0  ;;  %v2196_v12 = vpop.f32.mrb[73].mxu1 }
 0x75d   :  { %v1285_v13 = vpop.f32.mrb[74].mxu0  ;;  %v1395_v14 = vpop.f32.mrb[74].mxu1 }
 0x75e   :  { %v1305_v40 = vmul.f32 %v1285_v13, %v1201_v7  ;;  %v1415_v47 = vmul.f32 %v1395_v14, %v1201_v7  ;;  %v1419_v58 = vsel %vm233_vm2, %v1414_v10, 0.0  ;;  %v1309_v16 = vsel %vm233_vm2, %v1304_v63, 0.0  ;;  %v2181_v15 = vpop.f32.mrb[75].mxu0  ;;  %v2197_v26 = vpop.f32.mrb[75].mxu1 }
 0x75f   :  { %1420 = vadd.xlane.f32.xlu1 %v1419_v58  ;;  %1310 = vadd.xlane.f32.xlu0 %v1309_v16 }
 0x760   :  { %v1422_v42 = vsel %vm233_vm2, %v1415_v47, 0.0  ;;  %v1312_v57 = vsel %vm233_vm2, %v1305_v40, 0.0 }
 0x763   :  { %v1400_v59 = vpop.f32.mrb[76].mxu1  ;;  %1423 = vadd.xlane.f32.xlu0 %v1422_v42  ;;  %1313 = vadd.xlane.f32.xlu1 %v1312_v57  ;;  %v1290_v37 = vpop.f32.mrb[76].mxu0 }
 0x764   :  { %v1416_v27 = vmul.f32 %v1400_v59, %v1206_v4  ;;  %v1306_v60 = vmul.f32 %v1290_v37, %v1206_v4  ;;  %v2184_v1 = vpop.f32.mrb[77].mxu0  ;;  %v2200_v6 = vpop.f32.mrb[77].mxu1 }
 0x765   :  { %v1293_v19 = vpop.f32.mrb[78].mxu0  ;;  %v1403_v20 = vpop.f32.mrb[78].mxu1 }
 0x766   :  { %v1307_v2 = vmul.f32 %v1293_v19, %v1209_v5  ;;  %v1417_v8 = vmul.f32 %v1403_v20, %v1209_v5  ;;  %v1425_v9 = vsel %vm233_vm2, %v1416_v27, 0.0  ;;  %v1315_v22 = vsel %vm233_vm2, %v1306_v60, 0.0  ;;  %v2185_v25 = vpop.f32.mrb[79].mxu0  ;;  %v2201_v17 = vpop.f32.mrb[79].mxu1 }
 0x767   :  { %1426 = vadd.xlane.f32.xlu1 %v1425_v9  ;;  %1316 = vadd.xlane.f32.xlu0 %v1315_v22 }
 0x768   :  { %v1318_v39 = vsel %vm233_vm2, %v1307_v2, 0.0  ;;  %v1428_v55 = vsel %vm233_vm2, %v1417_v8, 0.0 }
 0x76b   :  { %1319 = vadd.xlane.f32.xlu1 %v1318_v39  ;;  %v1298_v48 = vpop.f32.mrb[80].mxu0  ;;  %v1408_v49 = vpop.f32.mrb[80].mxu1 }
 0x76c   :  { %v1308_v50 = vmul.f32 %v1298_v48, %v3252_v0  ;;  %v1418_v7 = vmul.f32 %v1408_v49, %v3252_v0  ;;  %v2188_v51 = vpop.f32.mrb[81].mxu0  ;;  %v2204_v34 = vpop.f32.mrb[81].mxu1 }
 0x76d   :  { %v1301_v36 = vpop.f32.mrb[82].mxu0  ;;  %v1411_v4 = vpop.f32.mrb[82].mxu1 }
 0x76e   :  { %v1321_v52 = vsel %vm233_vm2, %v1308_v50, 0.0  ;;  %v1431_v5 = vsel %vm233_vm2, %v1418_v7, 0.0  ;;  %v2189_v53 = vpop.f32.mrb[83].mxu0  ;;  %v2205_v54 = vpop.f32.mrb[83].mxu1 }
 0x76f   :  { %1322 = vadd.xlane.f32.xlu0 %v1321_v52  ;;  %1432 = vadd.xlane.f32.xlu1 %v1431_v5 }
 0x773   :  { %1429 = vadd.xlane.f32.xlu0 %v1428_v55 }
 0x774   :  { %2310 = shalt.err (!%p2307_p9)
}
 0x775   :  { %s2311_s7 = scalar_lea.hbm %s3371_s15, 256 }
 0x776   :  { %p2312_p10 = scmp.ne.s32.totalorder %s3371_s15, %s2311_s7  ;;  %p2315_p11 = scmp.lt.u32.totalorder %s2311_s7, %s3371_s15 }
 0x778   :  { %p2317_p12 = pnand %p2315_p11, %p2312_p10 }
 0x77a   :  { %2320 = shalt.err (!%p2317_p12)
}
 0x77b   :  { %s2399_s23 = smov 128   ;;  %s2400_s13 = smov 8  }
 0x77c   :  { %1720 = dma.vmem_to_hbm [thread:$0]  %s1715_s6, 256, %s3371_s15, [#allocation7], %s2399_s23, %s2399_s23, %s2400_s13  }
 0x77d   :  { %s2401_s4 = smov [#allocation5]   ;;  %s2402_s26 = smov [#allocation8]  }
 0x77e   :  { %s1705_s21 = sshll.u32 %s2401_s4, 4  ;;  %s1726_s27 = sshll.u32 %s2402_s26, 4  ;;  %s1706_s21 = int_to_ptr.vmem [resolvable:$true] %s1705_s21  ;;  %s3281_s27 = int_to_ptr.vmem [resolvable:$true] %s1726_s27 }
 0x77f   :  { %s2321_s10 = scalar_lea.vmem %s1706_s21, 16  ;;  %s2325_s11 = scalar_lea.vmem %s1706_s21, 32 }
 0x780   :  { %p2322_p13 = scmp.ne.s32.totalorder %s1706_s21, %s2321_s10  ;;  %p2326_p0 = scmp.lt.s32.totalorder %s1706_s21, %s1706_s21 }
 0x781   :  { %p2327_p1 = scmp.lt.s32.totalorder %s2325_s11, %s2321_s10 }
 0x783   :  { %p2328_p2 = por %p2327_p1, %p2326_p0 }
 0x785   :  { %p2329_p3 = pnand %p2328_p2, %p2322_p13 }
 0x787   :  { %2332 = shalt.err (!%p2329_p3)
}
 0x788   :  { %s2333_s2 = scalar_lea.hbm %s3370_s14, 16 }
 0x789   :  { %p2334_p4 = scmp.ne.s32.totalorder %s3370_s14, %s2333_s2  ;;  %p2337_p5 = scmp.lt.u32.totalorder %s2333_s2, %s3370_s14 }
 0x78b   :  { %p2339_p6 = pnand %p2337_p5, %p2334_p4 }
 0x78d   :  { %2342 = shalt.err (!%p2339_p6)
}
 0x78e   :  { %1708 = dma.vmem_to_hbm [thread:$0]  %s1706_s21, 16, %s3370_s14, [#allocation3]  }
 0x78f   :  { %s2343_s5 = scalar_lea.vmem %s3281_s27, 384  ;;  %p2348_p8 = scmp.lt.s32.totalorder %s3281_s27, %s3281_s27 }
 0x790   :  { %p2344_p7 = scmp.ne.s32.totalorder %s3281_s27, %s2343_s5  ;;  %p2349_p9 = scmp.lt.s32.totalorder %s2343_s5, %s2343_s5 }
 0x792   :  { %p2350_p10 = por %p2349_p9, %p2348_p8 }
 0x794   :  { %p2351_p11 = pnand %p2350_p10, %p2344_p7 }
 0x796   :  { %2354 = shalt.err (!%p2351_p11)
}
 0x797   :  { %s3387_s25 = sld [smem:[#allocation19_spill]] }
 0x79d   :  { %s2355_s28 = scalar_lea.hbm %s3387_s25, 384 }
 0x79e   :  { %p2356_p12 = scmp.ne.s32.totalorder %s3387_s25, %s2355_s28  ;;  %p2359_p13 = scmp.lt.u32.totalorder %s2355_s28, %s3387_s25 }
 0x7a0   :  { %p2361_p0 = pnand %p2359_p13, %p2356_p12 }
 0x7a2   :  { %2364 = shalt.err (!%p2361_p0)
}
 0x7a3   :  { %1732 = dma.vmem_to_hbm [thread:$0]  %s3281_s27, 384, %s3387_s25, [#allocation7], %s2399_s23, %s2399_s23, %s2400_s13  }
 0x7a4   :  { %s2403_s22 = smov [#allocation9]  }
 0x7a5   :  { %s1738_s16 = sshll.u32 %s2403_s22, 4  ;;  %s1739_s16 = int_to_ptr.vmem [resolvable:$true] %s1738_s16 }
 0x7a6   :  { %s2365_s3 = scalar_lea.vmem %s1739_s16, 1536  ;;  %p2370_p2 = scmp.lt.s32.totalorder %s1739_s16, %s1739_s16 }
 0x7a7   :  { %p2366_p1 = scmp.ne.s32.totalorder %s1739_s16, %s2365_s3  ;;  %p2371_p3 = scmp.lt.s32.totalorder %s2365_s3, %s2365_s3 }
 0x7a9   :  { %p2372_p4 = por %p2371_p3, %p2370_p2 }
 0x7ab   :  { %p2373_p5 = pnand %p2372_p4, %p2366_p1 }
 0x7ad   :  { %2376 = shalt.err (!%p2373_p5)
}
 0x7ae   :  { %s3388_s26 = sld [smem:[#allocation20_spill]] }
 0x7b4   :  { %s2377_s10 = scalar_lea.hbm %s3388_s26, 1536 }
 0x7b5   :  { %p2378_p6 = scmp.ne.s32.totalorder %s3388_s26, %s2377_s10  ;;  %p2381_p7 = scmp.lt.u32.totalorder %s2377_s10, %s3388_s26 }
 0x7b7   :  { %p2383_p8 = pnand %p2381_p7, %p2378_p6 }
 0x7b9   :  { %2386 = shalt.err (!%p2383_p8)
}
 0x7ba   :  { %1744 = dma.vmem_to_hbm [thread:$0]  %s1739_s16, 1536, %s3388_s26, [#allocation10], %s2399_s23, %s2399_s23, %s2400_s13   ;;  %vm1452_vm2 = vcmask 23552  }
 0x7bb   :  { %s3389_s18 = sld [smem:[#allocation17_spill]]  ;;  %s3390_s23 = sld [smem:[#allocation18_spill]] }
 0x7c1   :  { %v1872_v0 = vld [vmem:[%s3389_s18 + $0x1] ss:$0 sm:$0xff]  ;;  %v1861_v21 = vld [vmem:[%s3389_s18] ss:$0 sm:$0xff] }
 0x7ec   :  { %v1421_v33 = vpop.xlane.xlu1 %1420  ;;  %v1311_v35 = vpop.xlane.xlu0 %1310 }
 0x7ed   :  { %v1442_v56 = vmul.f32 %v1872_v0, %v1421_v33  ;;  %v1331_v44 = vmul.f32 %v1861_v21, %v1311_v35 }
 0x7ef   :  { %v1447_v3 = vadd.f32 %v1442_v56, %v1331_v44 }
 0x7f0   :  { %v1424_v23 = vpop.xlane.xlu0 %1423  ;;  %v1314_v45 = vpop.xlane.xlu1 %1313 }
 0x7f1   :  { %1453 = vst.msk [vmem:[%s3390_s23] sm:$0xff] %vm1452_vm2, %v1447_v3  ;;  %v1443_v28 = vmul.f32 %v1872_v0, %v1424_v23  ;;  %v1332_v29 = vmul.f32 %v1861_v21, %v1314_v45 }
 0x7f3   :  { %v1448_v30 = vadd.f32 %v1443_v28, %v1332_v29 }
 0x7f4   :  { %v1427_v43 = vpop.xlane.xlu1 %1426  ;;  %v1317_v31 = vpop.xlane.xlu0 %1316 }
 0x7f5   :  { %1454 = vst.msk [vmem:[%s3390_s23 + $0x8] sm:$0xff] %vm1452_vm2, %v1448_v30  ;;  %v1444_v61 = vmul.f32 %v1872_v0, %v1427_v43  ;;  %v1333_v32 = vmul.f32 %v1861_v21, %v1317_v31 }
 0x7f7   :  { %v1449_v41 = vadd.f32 %v1444_v61, %v1333_v32 }
 0x7f8   :  { %v1320_v62 = vpop.xlane.xlu1 %1319 }
 0x7f9   :  { %1455 = vst.msk [vmem:[%s3390_s23 + $0x10] sm:$0xff] %vm1452_vm2, %v1449_v41  ;;  %v1334_v46 = vmul.f32 %v1861_v21, %v1320_v62 }
 0x7fc   :  { %v1323_v63 = vpop.xlane.xlu0 %1322  ;;  %v1433_v10 = vpop.xlane.xlu1 %1432 }
 0x7fd   :  { %v1335_v11 = vmul.f32 %v1861_v21, %v1323_v63  ;;  %v1446_v12 = vmul.f32 %v1872_v0, %v1433_v10 }
 0x7ff   :  { %v1451_v13 = vadd.f32 %v1446_v12, %v1335_v11 }
 0x800   :  { %v1430_v14 = vpop.xlane.xlu0 %1429 }
 0x801   :  { %1457 = vst.msk [vmem:[%s3390_s23 + $0x20] sm:$0xff] %vm1452_vm2, %v1451_v13  ;;  %v1445_v40 = vmul.f32 %v1872_v0, %v1430_v14 }
 0x803   :  { %v1450_v47 = vadd.f32 %v1445_v40, %v1334_v46 }
 0x805   :  { %1456 = vst.msk [vmem:[%s3390_s23 + $0x18] sm:$0xff] %vm1452_vm2, %v1450_v47 }
 0x806   :  { %2389 = dma.done.wait [#allocation3], 16  }
 0x807   :  { %2390 = vsyncadd [#allocation3], 4294967280 }
 0x808   :  { %2391 = dma.done.wait [#allocation7], 640  }
 0x809   :  { %2392 = vsyncadd [#allocation7], 4294966656 }
 0x80a   :  { %2393 = dma.done.wait [#allocation10], 1536  }
 0x80b   :  { %2394 = vsyncadd [#allocation10], 4294965760 }
 0x80c   :  { %1759 = vsyncpa [#allocation3], 1 }
 0x80d   :  { %1760 = vsyncpa [#allocation7], 1 }
 0x80e   :  { %1761 = vsyncpa [#allocation10], 1 }
 0x80f   :  { %1762 = vsyncpa [#allocation4], 1 }

</bundles_post_ra>
